<compile_context>
chip_gen: v7x
topology: tpu7x:2x2x1
jax: 0.10.0
libtpu: 0.0.40
codegen_flags: <defaults>
</compile_context>

<pallas_src>
import jax
import jax.numpy as jnp
import numpy as np
from jax import lax
from jax.experimental import pallas as pl
from jax.experimental.pallas import tpu as pltpu

LANE = 128  # TPU lane width


def _round_up(n, m):
    return ((n + m - 1) // m) * m


def _pad_last(w, target):
    """Zero-pad the last axis of `w` up to `target` columns."""
    pad = target - w.shape[-1]
    if pad == 0:
        return w
    return jnp.pad(w, [(0, 0)] * (w.ndim - 1) + [(0, pad)])


def encoder_kernel(xf_ref, xb_ref, wih_f_ref, wih_b_ref, whh_f_ref, whh_b_ref,
                   b_f_ref, b_b_ref, out_ref, hst_ref, cst_ref):
    """One grid step = one time-chunk of the fused fwd+bwd LSTM recurrence."""
    TS, B, E = xf_ref.shape          # time-major chunk
    H, G4 = whh_f_ref.shape          # true hidden size, padded gate width
    OUTP = out_ref.shape[1]
    f32 = jnp.float32
    c = pl.program_id(0)
    nc = pl.num_programs(0)

    # ---- initialise recurrent state on the first chunk ----------------------
    @pl.when(c == 0)
    def _():
        hst_ref[...] = jnp.zeros_like(hst_ref)
        cst_ref[...] = jnp.zeros_like(cst_ref)

    # ---- hoisted input projection (bias folded in), bf16 MXU / f32 acc ------
    # x chunk is time-major -> rows of the 2-D view are ordered t*B + b, so the
    # recurrence below can consume them with static row slices (no repack).
    xf = xf_ref[...].reshape(TS * B, E)
    xb = xb_ref[...].reshape(TS * B, E)
    gf = jnp.dot(xf, wih_f_ref[...], preferred_element_type=f32) + b_f_ref[...]
    gb = jnp.dot(xb, wih_b_ref[...], preferred_element_type=f32) + b_b_ref[...]

    whh_f = whh_f_ref[...]           # bf16, (H, G4)
    whh_b = whh_b_ref[...]

    # ---- hoisted gate-activation constants (computed once per chunk) --------
    # tanh(x) = 2*sigmoid(2x) - 1  => one sigmoid pass covers all four gates.
    lane = lax.broadcasted_iota(jnp.int32, (2 * B, G4), 1)
    g_blk = (lane >= 2 * H) & (lane < 3 * H)               # g-gate lanes
    gate_scale = jnp.where(g_blk, 2.0, 1.0).astype(f32)    # pre-scale
    act_shift = jnp.where(g_blk, -1.0, 0.0).astype(f32)    # post-shift

    h_st = hst_ref[...]              # (2B, H) f32, rows [0:B]=fwd, [B:2B]=bwd
    c_st = cst_ref[...]

    # ---- fused fwd+bwd recurrence, fully unrolled over the chunk ------------
    for k in range(TS):
        rk = TS - 1 - k              # backward walks its chunk in reverse
        h_f = h_st[:B].astype(whh_f.dtype)
        h_b = h_st[B:].astype(whh_b.dtype)
        pre_f = gf[k * B:(k + 1) * B] + jnp.dot(
            h_f, whh_f, preferred_element_type=f32)
        pre_b = gb[rk * B:(rk + 1) * B] + jnp.dot(
            h_b, whh_b, preferred_element_type=f32)
        pre = jnp.concatenate([pre_f, pre_b], axis=0)      # (2B, G4), both dirs
        s = jax.nn.sigmoid(pre * gate_scale)                # single EUP pass
        act = s * gate_scale + act_shift                     # i,f,o=sig; g=tanh
        i = act[:, 0 * H:1 * H]
        f = act[:, 1 * H:2 * H]
        g = act[:, 2 * H:3 * H]
        o = act[:, 3 * H:4 * H]
        c_st = f * c_st + i * g
        h_st = o * jnp.tanh(c_st)

    hst_ref[...] = h_st
    cst_ref[...] = c_st

    # ---- emit the final hidden states after the last chunk (lane-dense) -----
    @pl.when(c == nc - 1)
    def _():
        pieces = [h_st[:B], h_st[B:]]
        if OUTP > 2 * H:
            pieces.append(jnp.zeros((B, OUTP - 2 * H), f32))
        out_ref[...] = jnp.concatenate(pieces, axis=-1)


def encoder_forward(x, params, *, time_chunk=32):
    """x: (batch, seq, embedding_dim) -> (batch, 2*hidden_dim)."""
    B, S, E = x.shape
    H = params["whh_f"].shape[0]
    G4 = _round_up(4 * H, LANE)            # packed gate width (128 for H=32)
    OUTP = _round_up(2 * H, LANE)          # lane-dense kernel output width

    # Largest divisor of S that is <= time_chunk: exact chunking with no
    # remainder handling and no full-unroll / VMEM cliff for long sequences.
    ts = min(time_chunk, S)
    while S % ts:
        ts -= 1
    nc = S // ts

    bf16, f32 = jnp.bfloat16, jnp.float32
    x_tm = jnp.transpose(x, (1, 0, 2)).astype(bf16)         # (S, B, E) time-major

    wih_f = _pad_last(params["wih_f"], G4).astype(bf16)
    wih_b = _pad_last(params["wih_b"], G4).astype(bf16)
    whh_f = _pad_last(params["whh_f"], G4).astype(bf16)
    whh_b = _pad_last(params["whh_b"], G4).astype(bf16)
    b_f = _pad_last(params["b_f"], G4).astype(f32)
    b_b = _pad_last(params["b_b"], G4).astype(f32)

    def const(shape):
        return pl.BlockSpec(shape, lambda c: (0,) * len(shape))

    grid_spec = pltpu.PrefetchScalarGridSpec(
        num_scalar_prefetch=0,
        grid=(nc,),
        in_specs=[
            pl.BlockSpec((ts, B, E), lambda c: (c, 0, 0)),            # x, fwd chunks
            pl.BlockSpec((ts, B, E), lambda c: (nc - 1 - c, 0, 0)),   # x, bwd chunks
            const((E, G4)),    # wih_f   (grid-invariant: DMA'd once)
            const((E, G4)),    # wih_b
            const((H, G4)),    # whh_f
            const((H, G4)),    # whh_b
            const((1, G4)),    # b_f
            const((1, G4)),    # b_b
        ],
        out_specs=pl.BlockSpec((B, OUTP), lambda c: (0, 0)),
        scratch_shapes=[
            pltpu.VMEM((2 * B, H), f32),   # stacked h: rows [0:B]=fwd, [B:2B]=bwd
            pltpu.VMEM((2 * B, H), f32),   # stacked c
        ],
    )

    out = pl.pallas_call(
        encoder_kernel,
        out_shape=jax.ShapeDtypeStruct((B, OUTP), f32),
        grid_spec=grid_spec,
        compiler_params=pltpu.CompilerParams(
            dimension_semantics=("arbitrary",),    # sequential: state in scratch
            vmem_limit_bytes=32 * 1024 * 1024),
    )(x_tm, x_tm, wih_f, wih_b, whh_f, whh_b, b_f, b_b)
    return out[:, :2 * H]


def make_params(key, embedding_dim, hidden_dim):
    """Deterministic synthetic weights, PyTorch-style uniform(-1/sqrt(H), 1/sqrt(H)).

    Layouts (already transposed for x @ W matmuls):
      wih_*: (embedding_dim, 4*hidden_dim)
      whh_*: (hidden_dim, 4*hidden_dim)
      b_*:   (1, 4*hidden_dim)   (= bias_ih + bias_hh)
    Gate order along the 4H axis: i, f, g, o.
    """
    H, E = hidden_dim, embedding_dim
    bound = 1.0 / np.sqrt(H)
    keys = jax.random.split(key, 8)

    def u(k, shape):
        return jax.random.uniform(k, shape, jnp.float32, -bound, bound)

    wih_f = u(keys[0], (4 * H, E)).T
    whh_f = u(keys[1], (4 * H, H)).T
    b_f = (u(keys[2], (4 * H,)) + u(keys[3], (4 * H,))).reshape(1, 4 * H)
    wih_b = u(keys[4], (4 * H, E)).T
    whh_b = u(keys[5], (4 * H, H)).T
    b_b = (u(keys[6], (4 * H,)) + u(keys[7], (4 * H,))).reshape(1, 4 * H)
    return dict(wih_f=wih_f, whh_f=whh_f, b_f=b_f,
                wih_b=wih_b, whh_b=whh_b, b_b=b_b)


def encoder_forward_ref(x, params):
    """Pure-JAX reference with the module's semantics (same bf16 matmul inputs /
    f32 accumulation & gate math as the kernel)."""
    bf16, f32 = jnp.bfloat16, jnp.float32
    x_tm = jnp.transpose(x, (1, 0, 2)).astype(bf16)
    H = params["whh_f"].shape[0]
    B = x_tm.shape[1]

    def run(wih, whh, b, xs):
        wih = wih.astype(bf16)
        whh = whh.astype(bf16)
        b = b.astype(f32)

        def step(carry, x_t):
            h, c = carry
            gates = (jnp.dot(x_t, wih, preferred_element_type=f32)
                     + jnp.dot(h.astype(bf16), whh, preferred_element_type=f32)
                     + b)
            i = jax.nn.sigmoid(gates[:, 0 * H:1 * H])
            f = jax.nn.sigmoid(gates[:, 1 * H:2 * H])
            g = jnp.tanh(gates[:, 2 * H:3 * H])
            o = jax.nn.sigmoid(gates[:, 3 * H:4 * H])
            c = f * c + i * g
            h = o * jnp.tanh(c)
            return (h, c), None

        h0 = jnp.zeros((B, H), f32)
        c0 = jnp.zeros((B, H), f32)
        (h, _), _ = lax.scan(step, (h0, c0), xs)
        return h

    h_f = run(params["wih_f"], params["whh_f"], params["b_f"], x_tm)
    h_b = run(params["wih_b"], params["whh_b"], params["b_b"], x_tm[::-1])
    return jnp.concatenate([h_f, h_b], axis=-1)


if __name__ == "__main__":
    batch, seq, embedding_dim, hidden_dim = 2, 16, 16, 32

    key = jax.random.PRNGKey(0)
    k_x, k_p = jax.random.split(key)
    x = jax.random.normal(k_x, (batch, seq, embedding_dim), jnp.float32)
    params = make_params(k_p, embedding_dim, hidden_dim)

    ref = jax.block_until_ready(encoder_forward_ref(x, params))

    # Single-chunk path (whole sequence in one grid step).
    out = jax.block_until_ready(encoder_forward(x, params, time_chunk=32))
    assert out.shape == (batch, 2 * hidden_dim), out.shape
    np.testing.assert_allclose(np.asarray(out, np.float32),
                               np.asarray(ref, np.float32),
                               rtol=5e-3, atol=5e-3)

    # Multi-chunk path (exercises the state carry across grid steps).
    out2 = jax.block_until_ready(encoder_forward(x, params, time_chunk=8))
    np.testing.assert_allclose(np.asarray(out2, np.float32),
                               np.asarray(ref, np.float32),
                               rtol=5e-3, atol=5e-3)

    print("KERNEL_OK")
</pallas_src>

<mosaic_0001>
module attributes {stable_mosaic.version = 11 : i64} {
  func.func @encoder_kernel(%arg0: i32, %arg1: memref<16x2x16xbf16, #tpu.memory_space<vmem>>, %arg2: memref<16x2x16xbf16, #tpu.memory_space<vmem>>, %arg3: memref<16x128xbf16, #tpu.memory_space<vmem>>, %arg4: memref<16x128xbf16, #tpu.memory_space<vmem>>, %arg5: memref<32x128xbf16, #tpu.memory_space<vmem>>, %arg6: memref<32x128xbf16, #tpu.memory_space<vmem>>, %arg7: memref<1x128xf32, #tpu.memory_space<vmem>>, %arg8: memref<1x128xf32, #tpu.memory_space<vmem>>, %arg9: memref<2x128xf32, #tpu.memory_space<vmem>>, %arg10: memref<4x32xf32, #tpu.memory_space<vmem>>, %arg11: memref<4x32xf32, #tpu.memory_space<vmem>>) attributes {dimension_semantics = [#tpu.dimension_semantics<arbitrary>], iteration_bounds = array<i64: 1>, scalar_prefetch = 0 : i64, scratch_operands = 2 : i64, tpu.core_type = #tpu.core_type<tc>, window_params = [{transform_indices = @transform_0, window_bounds = array<i64: 16, 2, 16>}, {transform_indices = @transform_1, window_bounds = array<i64: 16, 2, 16>}, {pipeline_mode = #tpu.pipeline_mode<synchronous>, transform_indices = @transform_2, window_bounds = array<i64: 16, 128>}, {pipeline_mode = #tpu.pipeline_mode<synchronous>, transform_indices = @transform_3, window_bounds = array<i64: 16, 128>}, {pipeline_mode = #tpu.pipeline_mode<synchronous>, transform_indices = @transform_4, window_bounds = array<i64: 32, 128>}, {pipeline_mode = #tpu.pipeline_mode<synchronous>, transform_indices = @transform_5, window_bounds = array<i64: 32, 128>}, {pipeline_mode = #tpu.pipeline_mode<synchronous>, transform_indices = @transform_6, window_bounds = array<i64: 1, 128>}, {pipeline_mode = #tpu.pipeline_mode<synchronous>, transform_indices = @transform_7, window_bounds = array<i64: 1, 128>}, {pipeline_mode = #tpu.pipeline_mode<synchronous>, transform_indices = @transform_8, window_bounds = array<i64: 2, 128>}]} {
    %c0_i32 = arith.constant 0 : i32
    %0 = arith.cmpi eq, %arg0, %c0_i32 : i32
    %1 = arith.extui %0 : i1 to i32
    %c0_i32_0 = arith.constant 0 : i32
    %2 = arith.cmpi ne, %1, %c0_i32_0 : i32
    scf.if %2 {
      %cst_81 = arith.constant 0.000000e+00 : f32
      %486 = vector.broadcast %cst_81 : f32 to vector<4x32xf32>
      %c0_82 = arith.constant 0 : index
      %c0_83 = arith.constant 0 : index
      %487 = vector.load %arg10[%c0_82, %c0_83] : memref<4x32xf32, #tpu.memory_space<vmem>>, vector<4x32xf32>
      tpu.vector_store %arg10[%c0_82, %c0_83], %486 {strides = array<i32>} : memref<4x32xf32, #tpu.memory_space<vmem>>, vector<4x32xf32>,
      %cst_84 = arith.constant 0.000000e+00 : f32
      %488 = vector.broadcast %cst_84 : f32 to vector<4x32xf32>
      %c0_85 = arith.constant 0 : index
      %c0_86 = arith.constant 0 : index
      %489 = vector.load %arg11[%c0_85, %c0_86] : memref<4x32xf32, #tpu.memory_space<vmem>>, vector<4x32xf32>
      tpu.vector_store %arg11[%c0_85, %c0_86], %488 {strides = array<i32>} : memref<4x32xf32, #tpu.memory_space<vmem>>, vector<4x32xf32>,
    } else {
    }
    %c0 = arith.constant 0 : index
    %c0_1 = arith.constant 0 : index
    %c0_2 = arith.constant 0 : index
    %3 = vector.load %arg1[%c0, %c0_1, %c0_2] : memref<16x2x16xbf16, #tpu.memory_space<vmem>>, vector<16x2x16xbf16>
    %4 = vector.shape_cast %3 : vector<16x2x16xbf16> to vector<32x16xbf16>
    %c0_3 = arith.constant 0 : index
    %c0_4 = arith.constant 0 : index
    %c0_5 = arith.constant 0 : index
    %5 = vector.load %arg2[%c0_3, %c0_4, %c0_5] : memref<16x2x16xbf16, #tpu.memory_space<vmem>>, vector<16x2x16xbf16>
    %6 = vector.shape_cast %5 : vector<16x2x16xbf16> to vector<32x16xbf16>
    %c0_6 = arith.constant 0 : index
    %c0_7 = arith.constant 0 : index
    %7 = vector.load %arg3[%c0_6, %c0_7] : memref<16x128xbf16, #tpu.memory_space<vmem>>, vector<16x128xbf16>
    %cst = arith.constant dense<0.000000e+00> : vector<32x128xf32>
    %8 = tpu.matmul %4, %7, %cst {dimension_numbers = #tpu.dot_dimension_numbers<[1], [0], [0], [1], [0, 0, 1, 1], [], []>} : vector<32x16xbf16>, vector<16x128xbf16>, vector<32x128xf32> -> vector<32x128xf32>
    %c0_8 = arith.constant 0 : index
    %c0_9 = arith.constant 0 : index
    %9 = vector.load %arg7[%c0_8, %c0_9] : memref<1x128xf32, #tpu.memory_space<vmem>>, vector<1x128xf32>
    %10 = vector.broadcast %9 : vector<1x128xf32> to vector<32x128xf32>
    %11 = arith.addf %8, %10 : vector<32x128xf32>
    %c0_10 = arith.constant 0 : index
    %c0_11 = arith.constant 0 : index
    %12 = vector.load %arg4[%c0_10, %c0_11] : memref<16x128xbf16, #tpu.memory_space<vmem>>, vector<16x128xbf16>
    %cst_12 = arith.constant dense<0.000000e+00> : vector<32x128xf32>
    %13 = tpu.matmul %6, %12, %cst_12 {dimension_numbers = #tpu.dot_dimension_numbers<[1], [0], [0], [1], [0, 0, 1, 1], [], []>} : vector<32x16xbf16>, vector<16x128xbf16>, vector<32x128xf32> -> vector<32x128xf32>
    %c0_13 = arith.constant 0 : index
    %c0_14 = arith.constant 0 : index
    %14 = vector.load %arg8[%c0_13, %c0_14] : memref<1x128xf32, #tpu.memory_space<vmem>>, vector<1x128xf32>
    %15 = vector.broadcast %14 : vector<1x128xf32> to vector<32x128xf32>
    %16 = arith.addf %13, %15 : vector<32x128xf32>
    %c0_15 = arith.constant 0 : index
    %c0_16 = arith.constant 0 : index
    %17 = vector.load %arg5[%c0_15, %c0_16] : memref<32x128xbf16, #tpu.memory_space<vmem>>, vector<32x128xbf16>
    %c0_17 = arith.constant 0 : index
    %c0_18 = arith.constant 0 : index
    %18 = vector.load %arg6[%c0_17, %c0_18] : memref<32x128xbf16, #tpu.memory_space<vmem>>, vector<32x128xbf16>
    %19 = tpu.iota {dimensions = array<i32: 1>} : vector<4x128xi32>
    %c64_i32 = arith.constant 64 : i32
    %20 = vector.broadcast %c64_i32 : i32 to vector<4x128xi32>
    %21 = arith.cmpi sge, %19, %20 : vector<4x128xi32>
    %c96_i32 = arith.constant 96 : i32
    %22 = vector.broadcast %c96_i32 : i32 to vector<4x128xi32>
    %23 = arith.cmpi slt, %19, %22 : vector<4x128xi32>
    %24 = arith.andi %21, %23 : vector<4x128xi1>
    %cst_19 = arith.constant 2.000000e+00 : f32
    %cst_20 = arith.constant 1.000000e+00 : f32
    %25 = vector.broadcast %cst_19 : f32 to vector<4x128xf32>
    %26 = vector.broadcast %cst_20 : f32 to vector<4x128xf32>
    %27 = arith.select %24, %25, %26 : vector<4x128xi1>, vector<4x128xf32>
    %cst_21 = arith.constant -1.000000e+00 : f32
    %cst_22 = arith.constant 0.000000e+00 : f32
    %28 = vector.broadcast %cst_21 : f32 to vector<4x128xf32>
    %29 = vector.broadcast %cst_22 : f32 to vector<4x128xf32>
    %30 = arith.select %24, %28, %29 : vector<4x128xi1>, vector<4x128xf32>
    %c0_23 = arith.constant 0 : index
    %c0_24 = arith.constant 0 : index
    %31 = vector.load %arg10[%c0_23, %c0_24] : memref<4x32xf32, #tpu.memory_space<vmem>>, vector<4x32xf32>
    %c0_25 = arith.constant 0 : index
    %c0_26 = arith.constant 0 : index
    %32 = vector.load %arg11[%c0_25, %c0_26] : memref<4x32xf32, #tpu.memory_space<vmem>>, vector<4x32xf32>
    %33 = vector.extract_strided_slice %31 {offsets = [0, 0], sizes = [2, 32], strides = [1, 1]} : vector<4x32xf32> to vector<2x32xf32>
    %34 = arith.truncf %33 : vector<2x32xf32> to vector<2x32xbf16>
    %35 = vector.extract_strided_slice %31 {offsets = [2, 0], sizes = [2, 32], strides = [1, 1]} : vector<4x32xf32> to vector<2x32xf32>
    %36 = arith.truncf %35 : vector<2x32xf32> to vector<2x32xbf16>
    %37 = vector.extract_strided_slice %11 {offsets = [0, 0], sizes = [2, 128], strides = [1, 1]} : vector<32x128xf32> to vector<2x128xf32>
    %cst_27 = arith.constant dense<0.000000e+00> : vector<2x128xf32>
    %38 = tpu.matmul %34, %17, %cst_27 {dimension_numbers = #tpu.dot_dimension_numbers<[1], [0], [0], [1], [0, 0, 1, 1], [], []>} : vector<2x32xbf16>, vector<32x128xbf16>, vector<2x128xf32> -> vector<2x128xf32>
    %39 = arith.addf %37, %38 : vector<2x128xf32>
    %40 = vector.extract_strided_slice %16 {offsets = [30, 0], sizes = [2, 128], strides = [1, 1]} : vector<32x128xf32> to vector<2x128xf32>
    %cst_28 = arith.constant dense<0.000000e+00> : vector<2x128xf32>
    %41 = tpu.matmul %36, %18, %cst_28 {dimension_numbers = #tpu.dot_dimension_numbers<[1], [0], [0], [1], [0, 0, 1, 1], [], []>} : vector<2x32xbf16>, vector<32x128xbf16>, vector<2x128xf32> -> vector<2x128xf32>
    %42 = arith.addf %40, %41 : vector<2x128xf32>
    %43 = tpu.concatenate %39, %42 in 0 : vector<2x128xf32>, vector<2x128xf32> -> vector<4x128xf32>
    %44 = arith.mulf %43, %27 : vector<4x128xf32>
    %45 = arith.negf %44 : vector<4x128xf32>
    %46 = math.exp %45 : vector<4x128xf32>
    %cst_29 = arith.constant 1.000000e+00 : f32
    %47 = vector.broadcast %cst_29 : f32 to vector<4x128xf32>
    %48 = arith.addf %47, %46 : vector<4x128xf32>
    %49 = arith.divf %47, %48 : vector<4x128xf32>
    %50 = arith.mulf %49, %27 : vector<4x128xf32>
    %51 = arith.addf %50, %30 : vector<4x128xf32>
    %52 = vector.extract_strided_slice %51 {offsets = [0, 0], sizes = [4, 32], strides = [1, 1]} : vector<4x128xf32> to vector<4x32xf32>
    %53 = vector.extract_strided_slice %51 {offsets = [0, 32], sizes = [4, 32], strides = [1, 1]} : vector<4x128xf32> to vector<4x32xf32>
    %54 = vector.extract_strided_slice %51 {offsets = [0, 64], sizes = [4, 32], strides = [1, 1]} : vector<4x128xf32> to vector<4x32xf32>
    %55 = vector.extract_strided_slice %51 {offsets = [0, 96], sizes = [4, 32], strides = [1, 1]} : vector<4x128xf32> to vector<4x32xf32>
    %56 = arith.mulf %53, %32 : vector<4x32xf32>
    %57 = arith.mulf %52, %54 : vector<4x32xf32>
    %58 = arith.addf %56, %57 : vector<4x32xf32>
    %59 = math.tanh %58 : vector<4x32xf32>
    %60 = arith.mulf %55, %59 : vector<4x32xf32>
    %61 = vector.extract_strided_slice %60 {offsets = [0, 0], sizes = [2, 32], strides = [1, 1]} : vector<4x32xf32> to vector<2x32xf32>
    %62 = arith.truncf %61 : vector<2x32xf32> to vector<2x32xbf16>
    %63 = vector.extract_strided_slice %60 {offsets = [2, 0], sizes = [2, 32], strides = [1, 1]} : vector<4x32xf32> to vector<2x32xf32>
    %64 = arith.truncf %63 : vector<2x32xf32> to vector<2x32xbf16>
    %65 = vector.extract_strided_slice %11 {offsets = [2, 0], sizes = [2, 128], strides = [1, 1]} : vector<32x128xf32> to vector<2x128xf32>
    %cst_30 = arith.constant dense<0.000000e+00> : vector<2x128xf32>
    %66 = tpu.matmul %62, %17, %cst_30 {dimension_numbers = #tpu.dot_dimension_numbers<[1], [0], [0], [1], [0, 0, 1, 1], [], []>} : vector<2x32xbf16>, vector<32x128xbf16>, vector<2x128xf32> -> vector<2x128xf32>
    %67 = arith.addf %65, %66 : vector<2x128xf32>
    %68 = vector.extract_strided_slice %16 {offsets = [28, 0], sizes = [2, 128], strides = [1, 1]} : vector<32x128xf32> to vector<2x128xf32>
    %cst_31 = arith.constant dense<0.000000e+00> : vector<2x128xf32>
    %69 = tpu.matmul %64, %18, %cst_31 {dimension_numbers = #tpu.dot_dimension_numbers<[1], [0], [0], [1], [0, 0, 1, 1], [], []>} : vector<2x32xbf16>, vector<32x128xbf16>, vector<2x128xf32> -> vector<2x128xf32>
    %70 = arith.addf %68, %69 : vector<2x128xf32>
    %71 = tpu.concatenate %67, %70 in 0 : vector<2x128xf32>, vector<2x128xf32> -> vector<4x128xf32>
    %72 = arith.mulf %71, %27 : vector<4x128xf32>
    %73 = arith.negf %72 : vector<4x128xf32>
    %74 = math.exp %73 : vector<4x128xf32>
    %cst_32 = arith.constant 1.000000e+00 : f32
    %75 = vector.broadcast %cst_32 : f32 to vector<4x128xf32>
    %76 = arith.addf %75, %74 : vector<4x128xf32>
    %77 = arith.divf %75, %76 : vector<4x128xf32>
    %78 = arith.mulf %77, %27 : vector<4x128xf32>
    %79 = arith.addf %78, %30 : vector<4x128xf32>
    %80 = vector.extract_strided_slice %79 {offsets = [0, 0], sizes = [4, 32], strides = [1, 1]} : vector<4x128xf32> to vector<4x32xf32>
    %81 = vector.extract_strided_slice %79 {offsets = [0, 32], sizes = [4, 32], strides = [1, 1]} : vector<4x128xf32> to vector<4x32xf32>
    %82 = vector.extract_strided_slice %79 {offsets = [0, 64], sizes = [4, 32], strides = [1, 1]} : vector<4x128xf32> to vector<4x32xf32>
    %83 = vector.extract_strided_slice %79 {offsets = [0, 96], sizes = [4, 32], strides = [1, 1]} : vector<4x128xf32> to vector<4x32xf32>
    %84 = arith.mulf %81, %58 : vector<4x32xf32>
    %85 = arith.mulf %80, %82 : vector<4x32xf32>
    %86 = arith.addf %84, %85 : vector<4x32xf32>
    %87 = math.tanh %86 : vector<4x32xf32>
    %88 = arith.mulf %83, %87 : vector<4x32xf32>
    %89 = vector.extract_strided_slice %88 {offsets = [0, 0], sizes = [2, 32], strides = [1, 1]} : vector<4x32xf32> to vector<2x32xf32>
    %90 = arith.truncf %89 : vector<2x32xf32> to vector<2x32xbf16>
    %91 = vector.extract_strided_slice %88 {offsets = [2, 0], sizes = [2, 32], strides = [1, 1]} : vector<4x32xf32> to vector<2x32xf32>
    %92 = arith.truncf %91 : vector<2x32xf32> to vector<2x32xbf16>
    %93 = vector.extract_strided_slice %11 {offsets = [4, 0], sizes = [2, 128], strides = [1, 1]} : vector<32x128xf32> to vector<2x128xf32>
    %cst_33 = arith.constant dense<0.000000e+00> : vector<2x128xf32>
    %94 = tpu.matmul %90, %17, %cst_33 {dimension_numbers = #tpu.dot_dimension_numbers<[1], [0], [0], [1], [0, 0, 1, 1], [], []>} : vector<2x32xbf16>, vector<32x128xbf16>, vector<2x128xf32> -> vector<2x128xf32>
    %95 = arith.addf %93, %94 : vector<2x128xf32>
    %96 = vector.extract_strided_slice %16 {offsets = [26, 0], sizes = [2, 128], strides = [1, 1]} : vector<32x128xf32> to vector<2x128xf32>
    %cst_34 = arith.constant dense<0.000000e+00> : vector<2x128xf32>
    %97 = tpu.matmul %92, %18, %cst_34 {dimension_numbers = #tpu.dot_dimension_numbers<[1], [0], [0], [1], [0, 0, 1, 1], [], []>} : vector<2x32xbf16>, vector<32x128xbf16>, vector<2x128xf32> -> vector<2x128xf32>
    %98 = arith.addf %96, %97 : vector<2x128xf32>
    %99 = tpu.concatenate %95, %98 in 0 : vector<2x128xf32>, vector<2x128xf32> -> vector<4x128xf32>
    %100 = arith.mulf %99, %27 : vector<4x128xf32>
    %101 = arith.negf %100 : vector<4x128xf32>
    %102 = math.exp %101 : vector<4x128xf32>
    %cst_35 = arith.constant 1.000000e+00 : f32
    %103 = vector.broadcast %cst_35 : f32 to vector<4x128xf32>
    %104 = arith.addf %103, %102 : vector<4x128xf32>
    %105 = arith.divf %103, %104 : vector<4x128xf32>
    %106 = arith.mulf %105, %27 : vector<4x128xf32>
    %107 = arith.addf %106, %30 : vector<4x128xf32>
    %108 = vector.extract_strided_slice %107 {offsets = [0, 0], sizes = [4, 32], strides = [1, 1]} : vector<4x128xf32> to vector<4x32xf32>
    %109 = vector.extract_strided_slice %107 {offsets = [0, 32], sizes = [4, 32], strides = [1, 1]} : vector<4x128xf32> to vector<4x32xf32>
    %110 = vector.extract_strided_slice %107 {offsets = [0, 64], sizes = [4, 32], strides = [1, 1]} : vector<4x128xf32> to vector<4x32xf32>
    %111 = vector.extract_strided_slice %107 {offsets = [0, 96], sizes = [4, 32], strides = [1, 1]} : vector<4x128xf32> to vector<4x32xf32>
    %112 = arith.mulf %109, %86 : vector<4x32xf32>
    %113 = arith.mulf %108, %110 : vector<4x32xf32>
    %114 = arith.addf %112, %113 : vector<4x32xf32>
    %115 = math.tanh %114 : vector<4x32xf32>
    %116 = arith.mulf %111, %115 : vector<4x32xf32>
    %117 = vector.extract_strided_slice %116 {offsets = [0, 0], sizes = [2, 32], strides = [1, 1]} : vector<4x32xf32> to vector<2x32xf32>
    %118 = arith.truncf %117 : vector<2x32xf32> to vector<2x32xbf16>
    %119 = vector.extract_strided_slice %116 {offsets = [2, 0], sizes = [2, 32], strides = [1, 1]} : vector<4x32xf32> to vector<2x32xf32>
    %120 = arith.truncf %119 : vector<2x32xf32> to vector<2x32xbf16>
    %121 = vector.extract_strided_slice %11 {offsets = [6, 0], sizes = [2, 128], strides = [1, 1]} : vector<32x128xf32> to vector<2x128xf32>
    %cst_36 = arith.constant dense<0.000000e+00> : vector<2x128xf32>
    %122 = tpu.matmul %118, %17, %cst_36 {dimension_numbers = #tpu.dot_dimension_numbers<[1], [0], [0], [1], [0, 0, 1, 1], [], []>} : vector<2x32xbf16>, vector<32x128xbf16>, vector<2x128xf32> -> vector<2x128xf32>
    %123 = arith.addf %121, %122 : vector<2x128xf32>
    %124 = vector.extract_strided_slice %16 {offsets = [24, 0], sizes = [2, 128], strides = [1, 1]} : vector<32x128xf32> to vector<2x128xf32>
    %cst_37 = arith.constant dense<0.000000e+00> : vector<2x128xf32>
    %125 = tpu.matmul %120, %18, %cst_37 {dimension_numbers = #tpu.dot_dimension_numbers<[1], [0], [0], [1], [0, 0, 1, 1], [], []>} : vector<2x32xbf16>, vector<32x128xbf16>, vector<2x128xf32> -> vector<2x128xf32>
    %126 = arith.addf %124, %125 : vector<2x128xf32>
    %127 = tpu.concatenate %123, %126 in 0 : vector<2x128xf32>, vector<2x128xf32> -> vector<4x128xf32>
    %128 = arith.mulf %127, %27 : vector<4x128xf32>
    %129 = arith.negf %128 : vector<4x128xf32>
    %130 = math.exp %129 : vector<4x128xf32>
    %cst_38 = arith.constant 1.000000e+00 : f32
    %131 = vector.broadcast %cst_38 : f32 to vector<4x128xf32>
    %132 = arith.addf %131, %130 : vector<4x128xf32>
    %133 = arith.divf %131, %132 : vector<4x128xf32>
    %134 = arith.mulf %133, %27 : vector<4x128xf32>
    %135 = arith.addf %134, %30 : vector<4x128xf32>
    %136 = vector.extract_strided_slice %135 {offsets = [0, 0], sizes = [4, 32], strides = [1, 1]} : vector<4x128xf32> to vector<4x32xf32>
    %137 = vector.extract_strided_slice %135 {offsets = [0, 32], sizes = [4, 32], strides = [1, 1]} : vector<4x128xf32> to vector<4x32xf32>
    %138 = vector.extract_strided_slice %135 {offsets = [0, 64], sizes = [4, 32], strides = [1, 1]} : vector<4x128xf32> to vector<4x32xf32>
    %139 = vector.extract_strided_slice %135 {offsets = [0, 96], sizes = [4, 32], strides = [1, 1]} : vector<4x128xf32> to vector<4x32xf32>
    %140 = arith.mulf %137, %114 : vector<4x32xf32>
    %141 = arith.mulf %136, %138 : vector<4x32xf32>
    %142 = arith.addf %140, %141 : vector<4x32xf32>
    %143 = math.tanh %142 : vector<4x32xf32>
    %144 = arith.mulf %139, %143 : vector<4x32xf32>
    %145 = vector.extract_strided_slice %144 {offsets = [0, 0], sizes = [2, 32], strides = [1, 1]} : vector<4x32xf32> to vector<2x32xf32>
    %146 = arith.truncf %145 : vector<2x32xf32> to vector<2x32xbf16>
    %147 = vector.extract_strided_slice %144 {offsets = [2, 0], sizes = [2, 32], strides = [1, 1]} : vector<4x32xf32> to vector<2x32xf32>
    %148 = arith.truncf %147 : vector<2x32xf32> to vector<2x32xbf16>
    %149 = vector.extract_strided_slice %11 {offsets = [8, 0], sizes = [2, 128], strides = [1, 1]} : vector<32x128xf32> to vector<2x128xf32>
    %cst_39 = arith.constant dense<0.000000e+00> : vector<2x128xf32>
    %150 = tpu.matmul %146, %17, %cst_39 {dimension_numbers = #tpu.dot_dimension_numbers<[1], [0], [0], [1], [0, 0, 1, 1], [], []>} : vector<2x32xbf16>, vector<32x128xbf16>, vector<2x128xf32> -> vector<2x128xf32>
    %151 = arith.addf %149, %150 : vector<2x128xf32>
    %152 = vector.extract_strided_slice %16 {offsets = [22, 0], sizes = [2, 128], strides = [1, 1]} : vector<32x128xf32> to vector<2x128xf32>
    %cst_40 = arith.constant dense<0.000000e+00> : vector<2x128xf32>
    %153 = tpu.matmul %148, %18, %cst_40 {dimension_numbers = #tpu.dot_dimension_numbers<[1], [0], [0], [1], [0, 0, 1, 1], [], []>} : vector<2x32xbf16>, vector<32x128xbf16>, vector<2x128xf32> -> vector<2x128xf32>
    %154 = arith.addf %152, %153 : vector<2x128xf32>
    %155 = tpu.concatenate %151, %154 in 0 : vector<2x128xf32>, vector<2x128xf32> -> vector<4x128xf32>
    %156 = arith.mulf %155, %27 : vector<4x128xf32>
    %157 = arith.negf %156 : vector<4x128xf32>
    %158 = math.exp %157 : vector<4x128xf32>
    %cst_41 = arith.constant 1.000000e+00 : f32
    %159 = vector.broadcast %cst_41 : f32 to vector<4x128xf32>
    %160 = arith.addf %159, %158 : vector<4x128xf32>
    %161 = arith.divf %159, %160 : vector<4x128xf32>
    %162 = arith.mulf %161, %27 : vector<4x128xf32>
    %163 = arith.addf %162, %30 : vector<4x128xf32>
    %164 = vector.extract_strided_slice %163 {offsets = [0, 0], sizes = [4, 32], strides = [1, 1]} : vector<4x128xf32> to vector<4x32xf32>
    %165 = vector.extract_strided_slice %163 {offsets = [0, 32], sizes = [4, 32], strides = [1, 1]} : vector<4x128xf32> to vector<4x32xf32>
    %166 = vector.extract_strided_slice %163 {offsets = [0, 64], sizes = [4, 32], strides = [1, 1]} : vector<4x128xf32> to vector<4x32xf32>
    %167 = vector.extract_strided_slice %163 {offsets = [0, 96], sizes = [4, 32], strides = [1, 1]} : vector<4x128xf32> to vector<4x32xf32>
    %168 = arith.mulf %165, %142 : vector<4x32xf32>
    %169 = arith.mulf %164, %166 : vector<4x32xf32>
    %170 = arith.addf %168, %169 : vector<4x32xf32>
    %171 = math.tanh %170 : vector<4x32xf32>
    %172 = arith.mulf %167, %171 : vector<4x32xf32>
    %173 = vector.extract_strided_slice %172 {offsets = [0, 0], sizes = [2, 32], strides = [1, 1]} : vector<4x32xf32> to vector<2x32xf32>
    %174 = arith.truncf %173 : vector<2x32xf32> to vector<2x32xbf16>
    %175 = vector.extract_strided_slice %172 {offsets = [2, 0], sizes = [2, 32], strides = [1, 1]} : vector<4x32xf32> to vector<2x32xf32>
    %176 = arith.truncf %175 : vector<2x32xf32> to vector<2x32xbf16>
    %177 = vector.extract_strided_slice %11 {offsets = [10, 0], sizes = [2, 128], strides = [1, 1]} : vector<32x128xf32> to vector<2x128xf32>
    %cst_42 = arith.constant dense<0.000000e+00> : vector<2x128xf32>
    %178 = tpu.matmul %174, %17, %cst_42 {dimension_numbers = #tpu.dot_dimension_numbers<[1], [0], [0], [1], [0, 0, 1, 1], [], []>} : vector<2x32xbf16>, vector<32x128xbf16>, vector<2x128xf32> -> vector<2x128xf32>
    %179 = arith.addf %177, %178 : vector<2x128xf32>
    %180 = vector.extract_strided_slice %16 {offsets = [20, 0], sizes = [2, 128], strides = [1, 1]} : vector<32x128xf32> to vector<2x128xf32>
    %cst_43 = arith.constant dense<0.000000e+00> : vector<2x128xf32>
    %181 = tpu.matmul %176, %18, %cst_43 {dimension_numbers = #tpu.dot_dimension_numbers<[1], [0], [0], [1], [0, 0, 1, 1], [], []>} : vector<2x32xbf16>, vector<32x128xbf16>, vector<2x128xf32> -> vector<2x128xf32>
    %182 = arith.addf %180, %181 : vector<2x128xf32>
    %183 = tpu.concatenate %179, %182 in 0 : vector<2x128xf32>, vector<2x128xf32> -> vector<4x128xf32>
    %184 = arith.mulf %183, %27 : vector<4x128xf32>
    %185 = arith.negf %184 : vector<4x128xf32>
    %186 = math.exp %185 : vector<4x128xf32>
    %cst_44 = arith.constant 1.000000e+00 : f32
    %187 = vector.broadcast %cst_44 : f32 to vector<4x128xf32>
    %188 = arith.addf %187, %186 : vector<4x128xf32>
    %189 = arith.divf %187, %188 : vector<4x128xf32>
    %190 = arith.mulf %189, %27 : vector<4x128xf32>
    %191 = arith.addf %190, %30 : vector<4x128xf32>
    %192 = vector.extract_strided_slice %191 {offsets = [0, 0], sizes = [4, 32], strides = [1, 1]} : vector<4x128xf32> to vector<4x32xf32>
    %193 = vector.extract_strided_slice %191 {offsets = [0, 32], sizes = [4, 32], strides = [1, 1]} : vector<4x128xf32> to vector<4x32xf32>
    %194 = vector.extract_strided_slice %191 {offsets = [0, 64], sizes = [4, 32], strides = [1, 1]} : vector<4x128xf32> to vector<4x32xf32>
    %195 = vector.extract_strided_slice %191 {offsets = [0, 96], sizes = [4, 32], strides = [1, 1]} : vector<4x128xf32> to vector<4x32xf32>
    %196 = arith.mulf %193, %170 : vector<4x32xf32>
    %197 = arith.mulf %192, %194 : vector<4x32xf32>
    %198 = arith.addf %196, %197 : vector<4x32xf32>
    %199 = math.tanh %198 : vector<4x32xf32>
    %200 = arith.mulf %195, %199 : vector<4x32xf32>
    %201 = vector.extract_strided_slice %200 {offsets = [0, 0], sizes = [2, 32], strides = [1, 1]} : vector<4x32xf32> to vector<2x32xf32>
    %202 = arith.truncf %201 : vector<2x32xf32> to vector<2x32xbf16>
    %203 = vector.extract_strided_slice %200 {offsets = [2, 0], sizes = [2, 32], strides = [1, 1]} : vector<4x32xf32> to vector<2x32xf32>
    %204 = arith.truncf %203 : vector<2x32xf32> to vector<2x32xbf16>
    %205 = vector.extract_strided_slice %11 {offsets = [12, 0], sizes = [2, 128], strides = [1, 1]} : vector<32x128xf32> to vector<2x128xf32>
    %cst_45 = arith.constant dense<0.000000e+00> : vector<2x128xf32>
    %206 = tpu.matmul %202, %17, %cst_45 {dimension_numbers = #tpu.dot_dimension_numbers<[1], [0], [0], [1], [0, 0, 1, 1], [], []>} : vector<2x32xbf16>, vector<32x128xbf16>, vector<2x128xf32> -> vector<2x128xf32>
    %207 = arith.addf %205, %206 : vector<2x128xf32>
    %208 = vector.extract_strided_slice %16 {offsets = [18, 0], sizes = [2, 128], strides = [1, 1]} : vector<32x128xf32> to vector<2x128xf32>
    %cst_46 = arith.constant dense<0.000000e+00> : vector<2x128xf32>
    %209 = tpu.matmul %204, %18, %cst_46 {dimension_numbers = #tpu.dot_dimension_numbers<[1], [0], [0], [1], [0, 0, 1, 1], [], []>} : vector<2x32xbf16>, vector<32x128xbf16>, vector<2x128xf32> -> vector<2x128xf32>
    %210 = arith.addf %208, %209 : vector<2x128xf32>
    %211 = tpu.concatenate %207, %210 in 0 : vector<2x128xf32>, vector<2x128xf32> -> vector<4x128xf32>
    %212 = arith.mulf %211, %27 : vector<4x128xf32>
    %213 = arith.negf %212 : vector<4x128xf32>
    %214 = math.exp %213 : vector<4x128xf32>
    %cst_47 = arith.constant 1.000000e+00 : f32
    %215 = vector.broadcast %cst_47 : f32 to vector<4x128xf32>
    %216 = arith.addf %215, %214 : vector<4x128xf32>
    %217 = arith.divf %215, %216 : vector<4x128xf32>
    %218 = arith.mulf %217, %27 : vector<4x128xf32>
    %219 = arith.addf %218, %30 : vector<4x128xf32>
    %220 = vector.extract_strided_slice %219 {offsets = [0, 0], sizes = [4, 32], strides = [1, 1]} : vector<4x128xf32> to vector<4x32xf32>
    %221 = vector.extract_strided_slice %219 {offsets = [0, 32], sizes = [4, 32], strides = [1, 1]} : vector<4x128xf32> to vector<4x32xf32>
    %222 = vector.extract_strided_slice %219 {offsets = [0, 64], sizes = [4, 32], strides = [1, 1]} : vector<4x128xf32> to vector<4x32xf32>
    %223 = vector.extract_strided_slice %219 {offsets = [0, 96], sizes = [4, 32], strides = [1, 1]} : vector<4x128xf32> to vector<4x32xf32>
    %224 = arith.mulf %221, %198 : vector<4x32xf32>
    %225 = arith.mulf %220, %222 : vector<4x32xf32>
    %226 = arith.addf %224, %225 : vector<4x32xf32>
    %227 = math.tanh %226 : vector<4x32xf32>
    %228 = arith.mulf %223, %227 : vector<4x32xf32>
    %229 = vector.extract_strided_slice %228 {offsets = [0, 0], sizes = [2, 32], strides = [1, 1]} : vector<4x32xf32> to vector<2x32xf32>
    %230 = arith.truncf %229 : vector<2x32xf32> to vector<2x32xbf16>
    %231 = vector.extract_strided_slice %228 {offsets = [2, 0], sizes = [2, 32], strides = [1, 1]} : vector<4x32xf32> to vector<2x32xf32>
    %232 = arith.truncf %231 : vector<2x32xf32> to vector<2x32xbf16>
    %233 = vector.extract_strided_slice %11 {offsets = [14, 0], sizes = [2, 128], strides = [1, 1]} : vector<32x128xf32> to vector<2x128xf32>
    %cst_48 = arith.constant dense<0.000000e+00> : vector<2x128xf32>
    %234 = tpu.matmul %230, %17, %cst_48 {dimension_numbers = #tpu.dot_dimension_numbers<[1], [0], [0], [1], [0, 0, 1, 1], [], []>} : vector<2x32xbf16>, vector<32x128xbf16>, vector<2x128xf32> -> vector<2x128xf32>
    %235 = arith.addf %233, %234 : vector<2x128xf32>
    %236 = vector.extract_strided_slice %16 {offsets = [16, 0], sizes = [2, 128], strides = [1, 1]} : vector<32x128xf32> to vector<2x128xf32>
    %cst_49 = arith.constant dense<0.000000e+00> : vector<2x128xf32>
    %237 = tpu.matmul %232, %18, %cst_49 {dimension_numbers = #tpu.dot_dimension_numbers<[1], [0], [0], [1], [0, 0, 1, 1], [], []>} : vector<2x32xbf16>, vector<32x128xbf16>, vector<2x128xf32> -> vector<2x128xf32>
    %238 = arith.addf %236, %237 : vector<2x128xf32>
    %239 = tpu.concatenate %235, %238 in 0 : vector<2x128xf32>, vector<2x128xf32> -> vector<4x128xf32>
    %240 = arith.mulf %239, %27 : vector<4x128xf32>
    %241 = arith.negf %240 : vector<4x128xf32>
    %242 = math.exp %241 : vector<4x128xf32>
    %cst_50 = arith.constant 1.000000e+00 : f32
    %243 = vector.broadcast %cst_50 : f32 to vector<4x128xf32>
    %244 = arith.addf %243, %242 : vector<4x128xf32>
    %245 = arith.divf %243, %244 : vector<4x128xf32>
    %246 = arith.mulf %245, %27 : vector<4x128xf32>
    %247 = arith.addf %246, %30 : vector<4x128xf32>
    %248 = vector.extract_strided_slice %247 {offsets = [0, 0], sizes = [4, 32], strides = [1, 1]} : vector<4x128xf32> to vector<4x32xf32>
    %249 = vector.extract_strided_slice %247 {offsets = [0, 32], sizes = [4, 32], strides = [1, 1]} : vector<4x128xf32> to vector<4x32xf32>
    %250 = vector.extract_strided_slice %247 {offsets = [0, 64], sizes = [4, 32], strides = [1, 1]} : vector<4x128xf32> to vector<4x32xf32>
    %251 = vector.extract_strided_slice %247 {offsets = [0, 96], sizes = [4, 32], strides = [1, 1]} : vector<4x128xf32> to vector<4x32xf32>
    %252 = arith.mulf %249, %226 : vector<4x32xf32>
    %253 = arith.mulf %248, %250 : vector<4x32xf32>
    %254 = arith.addf %252, %253 : vector<4x32xf32>
    %255 = math.tanh %254 : vector<4x32xf32>
    %256 = arith.mulf %251, %255 : vector<4x32xf32>
    %257 = vector.extract_strided_slice %256 {offsets = [0, 0], sizes = [2, 32], strides = [1, 1]} : vector<4x32xf32> to vector<2x32xf32>
    %258 = arith.truncf %257 : vector<2x32xf32> to vector<2x32xbf16>
    %259 = vector.extract_strided_slice %256 {offsets = [2, 0], sizes = [2, 32], strides = [1, 1]} : vector<4x32xf32> to vector<2x32xf32>
    %260 = arith.truncf %259 : vector<2x32xf32> to vector<2x32xbf16>
    %261 = vector.extract_strided_slice %11 {offsets = [16, 0], sizes = [2, 128], strides = [1, 1]} : vector<32x128xf32> to vector<2x128xf32>
    %cst_51 = arith.constant dense<0.000000e+00> : vector<2x128xf32>
    %262 = tpu.matmul %258, %17, %cst_51 {dimension_numbers = #tpu.dot_dimension_numbers<[1], [0], [0], [1], [0, 0, 1, 1], [], []>} : vector<2x32xbf16>, vector<32x128xbf16>, vector<2x128xf32> -> vector<2x128xf32>
    %263 = arith.addf %261, %262 : vector<2x128xf32>
    %264 = vector.extract_strided_slice %16 {offsets = [14, 0], sizes = [2, 128], strides = [1, 1]} : vector<32x128xf32> to vector<2x128xf32>
    %cst_52 = arith.constant dense<0.000000e+00> : vector<2x128xf32>
    %265 = tpu.matmul %260, %18, %cst_52 {dimension_numbers = #tpu.dot_dimension_numbers<[1], [0], [0], [1], [0, 0, 1, 1], [], []>} : vector<2x32xbf16>, vector<32x128xbf16>, vector<2x128xf32> -> vector<2x128xf32>
    %266 = arith.addf %264, %265 : vector<2x128xf32>
    %267 = tpu.concatenate %263, %266 in 0 : vector<2x128xf32>, vector<2x128xf32> -> vector<4x128xf32>
    %268 = arith.mulf %267, %27 : vector<4x128xf32>
    %269 = arith.negf %268 : vector<4x128xf32>
    %270 = math.exp %269 : vector<4x128xf32>
    %cst_53 = arith.constant 1.000000e+00 : f32
    %271 = vector.broadcast %cst_53 : f32 to vector<4x128xf32>
    %272 = arith.addf %271, %270 : vector<4x128xf32>
    %273 = arith.divf %271, %272 : vector<4x128xf32>
    %274 = arith.mulf %273, %27 : vector<4x128xf32>
    %275 = arith.addf %274, %30 : vector<4x128xf32>
    %276 = vector.extract_strided_slice %275 {offsets = [0, 0], sizes = [4, 32], strides = [1, 1]} : vector<4x128xf32> to vector<4x32xf32>
    %277 = vector.extract_strided_slice %275 {offsets = [0, 32], sizes = [4, 32], strides = [1, 1]} : vector<4x128xf32> to vector<4x32xf32>
    %278 = vector.extract_strided_slice %275 {offsets = [0, 64], sizes = [4, 32], strides = [1, 1]} : vector<4x128xf32> to vector<4x32xf32>
    %279 = vector.extract_strided_slice %275 {offsets = [0, 96], sizes = [4, 32], strides = [1, 1]} : vector<4x128xf32> to vector<4x32xf32>
    %280 = arith.mulf %277, %254 : vector<4x32xf32>
    %281 = arith.mulf %276, %278 : vector<4x32xf32>
    %282 = arith.addf %280, %281 : vector<4x32xf32>
    %283 = math.tanh %282 : vector<4x32xf32>
    %284 = arith.mulf %279, %283 : vector<4x32xf32>
    %285 = vector.extract_strided_slice %284 {offsets = [0, 0], sizes = [2, 32], strides = [1, 1]} : vector<4x32xf32> to vector<2x32xf32>
    %286 = arith.truncf %285 : vector<2x32xf32> to vector<2x32xbf16>
    %287 = vector.extract_strided_slice %284 {offsets = [2, 0], sizes = [2, 32], strides = [1, 1]} : vector<4x32xf32> to vector<2x32xf32>
    %288 = arith.truncf %287 : vector<2x32xf32> to vector<2x32xbf16>
    %289 = vector.extract_strided_slice %11 {offsets = [18, 0], sizes = [2, 128], strides = [1, 1]} : vector<32x128xf32> to vector<2x128xf32>
    %cst_54 = arith.constant dense<0.000000e+00> : vector<2x128xf32>
    %290 = tpu.matmul %286, %17, %cst_54 {dimension_numbers = #tpu.dot_dimension_numbers<[1], [0], [0], [1], [0, 0, 1, 1], [], []>} : vector<2x32xbf16>, vector<32x128xbf16>, vector<2x128xf32> -> vector<2x128xf32>
    %291 = arith.addf %289, %290 : vector<2x128xf32>
    %292 = vector.extract_strided_slice %16 {offsets = [12, 0], sizes = [2, 128], strides = [1, 1]} : vector<32x128xf32> to vector<2x128xf32>
    %cst_55 = arith.constant dense<0.000000e+00> : vector<2x128xf32>
    %293 = tpu.matmul %288, %18, %cst_55 {dimension_numbers = #tpu.dot_dimension_numbers<[1], [0], [0], [1], [0, 0, 1, 1], [], []>} : vector<2x32xbf16>, vector<32x128xbf16>, vector<2x128xf32> -> vector<2x128xf32>
    %294 = arith.addf %292, %293 : vector<2x128xf32>
    %295 = tpu.concatenate %291, %294 in 0 : vector<2x128xf32>, vector<2x128xf32> -> vector<4x128xf32>
    %296 = arith.mulf %295, %27 : vector<4x128xf32>
    %297 = arith.negf %296 : vector<4x128xf32>
    %298 = math.exp %297 : vector<4x128xf32>
    %cst_56 = arith.constant 1.000000e+00 : f32
    %299 = vector.broadcast %cst_56 : f32 to vector<4x128xf32>
    %300 = arith.addf %299, %298 : vector<4x128xf32>
    %301 = arith.divf %299, %300 : vector<4x128xf32>
    %302 = arith.mulf %301, %27 : vector<4x128xf32>
    %303 = arith.addf %302, %30 : vector<4x128xf32>
    %304 = vector.extract_strided_slice %303 {offsets = [0, 0], sizes = [4, 32], strides = [1, 1]} : vector<4x128xf32> to vector<4x32xf32>
    %305 = vector.extract_strided_slice %303 {offsets = [0, 32], sizes = [4, 32], strides = [1, 1]} : vector<4x128xf32> to vector<4x32xf32>
    %306 = vector.extract_strided_slice %303 {offsets = [0, 64], sizes = [4, 32], strides = [1, 1]} : vector<4x128xf32> to vector<4x32xf32>
    %307 = vector.extract_strided_slice %303 {offsets = [0, 96], sizes = [4, 32], strides = [1, 1]} : vector<4x128xf32> to vector<4x32xf32>
    %308 = arith.mulf %305, %282 : vector<4x32xf32>
    %309 = arith.mulf %304, %306 : vector<4x32xf32>
    %310 = arith.addf %308, %309 : vector<4x32xf32>
    %311 = math.tanh %310 : vector<4x32xf32>
    %312 = arith.mulf %307, %311 : vector<4x32xf32>
    %313 = vector.extract_strided_slice %312 {offsets = [0, 0], sizes = [2, 32], strides = [1, 1]} : vector<4x32xf32> to vector<2x32xf32>
    %314 = arith.truncf %313 : vector<2x32xf32> to vector<2x32xbf16>
    %315 = vector.extract_strided_slice %312 {offsets = [2, 0], sizes = [2, 32], strides = [1, 1]} : vector<4x32xf32> to vector<2x32xf32>
    %316 = arith.truncf %315 : vector<2x32xf32> to vector<2x32xbf16>
    %317 = vector.extract_strided_slice %11 {offsets = [20, 0], sizes = [2, 128], strides = [1, 1]} : vector<32x128xf32> to vector<2x128xf32>
    %cst_57 = arith.constant dense<0.000000e+00> : vector<2x128xf32>
    %318 = tpu.matmul %314, %17, %cst_57 {dimension_numbers = #tpu.dot_dimension_numbers<[1], [0], [0], [1], [0, 0, 1, 1], [], []>} : vector<2x32xbf16>, vector<32x128xbf16>, vector<2x128xf32> -> vector<2x128xf32>
    %319 = arith.addf %317, %318 : vector<2x128xf32>
    %320 = vector.extract_strided_slice %16 {offsets = [10, 0], sizes = [2, 128], strides = [1, 1]} : vector<32x128xf32> to vector<2x128xf32>
    %cst_58 = arith.constant dense<0.000000e+00> : vector<2x128xf32>
    %321 = tpu.matmul %316, %18, %cst_58 {dimension_numbers = #tpu.dot_dimension_numbers<[1], [0], [0], [1], [0, 0, 1, 1], [], []>} : vector<2x32xbf16>, vector<32x128xbf16>, vector<2x128xf32> -> vector<2x128xf32>
    %322 = arith.addf %320, %321 : vector<2x128xf32>
    %323 = tpu.concatenate %319, %322 in 0 : vector<2x128xf32>, vector<2x128xf32> -> vector<4x128xf32>
    %324 = arith.mulf %323, %27 : vector<4x128xf32>
    %325 = arith.negf %324 : vector<4x128xf32>
    %326 = math.exp %325 : vector<4x128xf32>
    %cst_59 = arith.constant 1.000000e+00 : f32
    %327 = vector.broadcast %cst_59 : f32 to vector<4x128xf32>
    %328 = arith.addf %327, %326 : vector<4x128xf32>
    %329 = arith.divf %327, %328 : vector<4x128xf32>
    %330 = arith.mulf %329, %27 : vector<4x128xf32>
    %331 = arith.addf %330, %30 : vector<4x128xf32>
    %332 = vector.extract_strided_slice %331 {offsets = [0, 0], sizes = [4, 32], strides = [1, 1]} : vector<4x128xf32> to vector<4x32xf32>
    %333 = vector.extract_strided_slice %331 {offsets = [0, 32], sizes = [4, 32], strides = [1, 1]} : vector<4x128xf32> to vector<4x32xf32>
    %334 = vector.extract_strided_slice %331 {offsets = [0, 64], sizes = [4, 32], strides = [1, 1]} : vector<4x128xf32> to vector<4x32xf32>
    %335 = vector.extract_strided_slice %331 {offsets = [0, 96], sizes = [4, 32], strides = [1, 1]} : vector<4x128xf32> to vector<4x32xf32>
    %336 = arith.mulf %333, %310 : vector<4x32xf32>
    %337 = arith.mulf %332, %334 : vector<4x32xf32>
    %338 = arith.addf %336, %337 : vector<4x32xf32>
    %339 = math.tanh %338 : vector<4x32xf32>
    %340 = arith.mulf %335, %339 : vector<4x32xf32>
    %341 = vector.extract_strided_slice %340 {offsets = [0, 0], sizes = [2, 32], strides = [1, 1]} : vector<4x32xf32> to vector<2x32xf32>
    %342 = arith.truncf %341 : vector<2x32xf32> to vector<2x32xbf16>
    %343 = vector.extract_strided_slice %340 {offsets = [2, 0], sizes = [2, 32], strides = [1, 1]} : vector<4x32xf32> to vector<2x32xf32>
    %344 = arith.truncf %343 : vector<2x32xf32> to vector<2x32xbf16>
    %345 = vector.extract_strided_slice %11 {offsets = [22, 0], sizes = [2, 128], strides = [1, 1]} : vector<32x128xf32> to vector<2x128xf32>
    %cst_60 = arith.constant dense<0.000000e+00> : vector<2x128xf32>
    %346 = tpu.matmul %342, %17, %cst_60 {dimension_numbers = #tpu.dot_dimension_numbers<[1], [0], [0], [1], [0, 0, 1, 1], [], []>} : vector<2x32xbf16>, vector<32x128xbf16>, vector<2x128xf32> -> vector<2x128xf32>
    %347 = arith.addf %345, %346 : vector<2x128xf32>
    %348 = vector.extract_strided_slice %16 {offsets = [8, 0], sizes = [2, 128], strides = [1, 1]} : vector<32x128xf32> to vector<2x128xf32>
    %cst_61 = arith.constant dense<0.000000e+00> : vector<2x128xf32>
    %349 = tpu.matmul %344, %18, %cst_61 {dimension_numbers = #tpu.dot_dimension_numbers<[1], [0], [0], [1], [0, 0, 1, 1], [], []>} : vector<2x32xbf16>, vector<32x128xbf16>, vector<2x128xf32> -> vector<2x128xf32>
    %350 = arith.addf %348, %349 : vector<2x128xf32>
    %351 = tpu.concatenate %347, %350 in 0 : vector<2x128xf32>, vector<2x128xf32> -> vector<4x128xf32>
    %352 = arith.mulf %351, %27 : vector<4x128xf32>
    %353 = arith.negf %352 : vector<4x128xf32>
    %354 = math.exp %353 : vector<4x128xf32>
    %cst_62 = arith.constant 1.000000e+00 : f32
    %355 = vector.broadcast %cst_62 : f32 to vector<4x128xf32>
    %356 = arith.addf %355, %354 : vector<4x128xf32>
    %357 = arith.divf %355, %356 : vector<4x128xf32>
    %358 = arith.mulf %357, %27 : vector<4x128xf32>
    %359 = arith.addf %358, %30 : vector<4x128xf32>
    %360 = vector.extract_strided_slice %359 {offsets = [0, 0], sizes = [4, 32], strides = [1, 1]} : vector<4x128xf32> to vector<4x32xf32>
    %361 = vector.extract_strided_slice %359 {offsets = [0, 32], sizes = [4, 32], strides = [1, 1]} : vector<4x128xf32> to vector<4x32xf32>
    %362 = vector.extract_strided_slice %359 {offsets = [0, 64], sizes = [4, 32], strides = [1, 1]} : vector<4x128xf32> to vector<4x32xf32>
    %363 = vector.extract_strided_slice %359 {offsets = [0, 96], sizes = [4, 32], strides = [1, 1]} : vector<4x128xf32> to vector<4x32xf32>
    %364 = arith.mulf %361, %338 : vector<4x32xf32>
    %365 = arith.mulf %360, %362 : vector<4x32xf32>
    %366 = arith.addf %364, %365 : vector<4x32xf32>
    %367 = math.tanh %366 : vector<4x32xf32>
    %368 = arith.mulf %363, %367 : vector<4x32xf32>
    %369 = vector.extract_strided_slice %368 {offsets = [0, 0], sizes = [2, 32], strides = [1, 1]} : vector<4x32xf32> to vector<2x32xf32>
    %370 = arith.truncf %369 : vector<2x32xf32> to vector<2x32xbf16>
    %371 = vector.extract_strided_slice %368 {offsets = [2, 0], sizes = [2, 32], strides = [1, 1]} : vector<4x32xf32> to vector<2x32xf32>
    %372 = arith.truncf %371 : vector<2x32xf32> to vector<2x32xbf16>
    %373 = vector.extract_strided_slice %11 {offsets = [24, 0], sizes = [2, 128], strides = [1, 1]} : vector<32x128xf32> to vector<2x128xf32>
    %cst_63 = arith.constant dense<0.000000e+00> : vector<2x128xf32>
    %374 = tpu.matmul %370, %17, %cst_63 {dimension_numbers = #tpu.dot_dimension_numbers<[1], [0], [0], [1], [0, 0, 1, 1], [], []>} : vector<2x32xbf16>, vector<32x128xbf16>, vector<2x128xf32> -> vector<2x128xf32>
    %375 = arith.addf %373, %374 : vector<2x128xf32>
    %376 = vector.extract_strided_slice %16 {offsets = [6, 0], sizes = [2, 128], strides = [1, 1]} : vector<32x128xf32> to vector<2x128xf32>
    %cst_64 = arith.constant dense<0.000000e+00> : vector<2x128xf32>
    %377 = tpu.matmul %372, %18, %cst_64 {dimension_numbers = #tpu.dot_dimension_numbers<[1], [0], [0], [1], [0, 0, 1, 1], [], []>} : vector<2x32xbf16>, vector<32x128xbf16>, vector<2x128xf32> -> vector<2x128xf32>
    %378 = arith.addf %376, %377 : vector<2x128xf32>
    %379 = tpu.concatenate %375, %378 in 0 : vector<2x128xf32>, vector<2x128xf32> -> vector<4x128xf32>
    %380 = arith.mulf %379, %27 : vector<4x128xf32>
    %381 = arith.negf %380 : vector<4x128xf32>
    %382 = math.exp %381 : vector<4x128xf32>
    %cst_65 = arith.constant 1.000000e+00 : f32
    %383 = vector.broadcast %cst_65 : f32 to vector<4x128xf32>
    %384 = arith.addf %383, %382 : vector<4x128xf32>
    %385 = arith.divf %383, %384 : vector<4x128xf32>
    %386 = arith.mulf %385, %27 : vector<4x128xf32>
    %387 = arith.addf %386, %30 : vector<4x128xf32>
    %388 = vector.extract_strided_slice %387 {offsets = [0, 0], sizes = [4, 32], strides = [1, 1]} : vector<4x128xf32> to vector<4x32xf32>
    %389 = vector.extract_strided_slice %387 {offsets = [0, 32], sizes = [4, 32], strides = [1, 1]} : vector<4x128xf32> to vector<4x32xf32>
    %390 = vector.extract_strided_slice %387 {offsets = [0, 64], sizes = [4, 32], strides = [1, 1]} : vector<4x128xf32> to vector<4x32xf32>
    %391 = vector.extract_strided_slice %387 {offsets = [0, 96], sizes = [4, 32], strides = [1, 1]} : vector<4x128xf32> to vector<4x32xf32>
    %392 = arith.mulf %389, %366 : vector<4x32xf32>
    %393 = arith.mulf %388, %390 : vector<4x32xf32>
    %394 = arith.addf %392, %393 : vector<4x32xf32>
    %395 = math.tanh %394 : vector<4x32xf32>
    %396 = arith.mulf %391, %395 : vector<4x32xf32>
    %397 = vector.extract_strided_slice %396 {offsets = [0, 0], sizes = [2, 32], strides = [1, 1]} : vector<4x32xf32> to vector<2x32xf32>
    %398 = arith.truncf %397 : vector<2x32xf32> to vector<2x32xbf16>
    %399 = vector.extract_strided_slice %396 {offsets = [2, 0], sizes = [2, 32], strides = [1, 1]} : vector<4x32xf32> to vector<2x32xf32>
    %400 = arith.truncf %399 : vector<2x32xf32> to vector<2x32xbf16>
    %401 = vector.extract_strided_slice %11 {offsets = [26, 0], sizes = [2, 128], strides = [1, 1]} : vector<32x128xf32> to vector<2x128xf32>
    %cst_66 = arith.constant dense<0.000000e+00> : vector<2x128xf32>
    %402 = tpu.matmul %398, %17, %cst_66 {dimension_numbers = #tpu.dot_dimension_numbers<[1], [0], [0], [1], [0, 0, 1, 1], [], []>} : vector<2x32xbf16>, vector<32x128xbf16>, vector<2x128xf32> -> vector<2x128xf32>
    %403 = arith.addf %401, %402 : vector<2x128xf32>
    %404 = vector.extract_strided_slice %16 {offsets = [4, 0], sizes = [2, 128], strides = [1, 1]} : vector<32x128xf32> to vector<2x128xf32>
    %cst_67 = arith.constant dense<0.000000e+00> : vector<2x128xf32>
    %405 = tpu.matmul %400, %18, %cst_67 {dimension_numbers = #tpu.dot_dimension_numbers<[1], [0], [0], [1], [0, 0, 1, 1], [], []>} : vector<2x32xbf16>, vector<32x128xbf16>, vector<2x128xf32> -> vector<2x128xf32>
    %406 = arith.addf %404, %405 : vector<2x128xf32>
    %407 = tpu.concatenate %403, %406 in 0 : vector<2x128xf32>, vector<2x128xf32> -> vector<4x128xf32>
    %408 = arith.mulf %407, %27 : vector<4x128xf32>
    %409 = arith.negf %408 : vector<4x128xf32>
    %410 = math.exp %409 : vector<4x128xf32>
    %cst_68 = arith.constant 1.000000e+00 : f32
    %411 = vector.broadcast %cst_68 : f32 to vector<4x128xf32>
    %412 = arith.addf %411, %410 : vector<4x128xf32>
    %413 = arith.divf %411, %412 : vector<4x128xf32>
    %414 = arith.mulf %413, %27 : vector<4x128xf32>
    %415 = arith.addf %414, %30 : vector<4x128xf32>
    %416 = vector.extract_strided_slice %415 {offsets = [0, 0], sizes = [4, 32], strides = [1, 1]} : vector<4x128xf32> to vector<4x32xf32>
    %417 = vector.extract_strided_slice %415 {offsets = [0, 32], sizes = [4, 32], strides = [1, 1]} : vector<4x128xf32> to vector<4x32xf32>
    %418 = vector.extract_strided_slice %415 {offsets = [0, 64], sizes = [4, 32], strides = [1, 1]} : vector<4x128xf32> to vector<4x32xf32>
    %419 = vector.extract_strided_slice %415 {offsets = [0, 96], sizes = [4, 32], strides = [1, 1]} : vector<4x128xf32> to vector<4x32xf32>
    %420 = arith.mulf %417, %394 : vector<4x32xf32>
    %421 = arith.mulf %416, %418 : vector<4x32xf32>
    %422 = arith.addf %420, %421 : vector<4x32xf32>
    %423 = math.tanh %422 : vector<4x32xf32>
    %424 = arith.mulf %419, %423 : vector<4x32xf32>
    %425 = vector.extract_strided_slice %424 {offsets = [0, 0], sizes = [2, 32], strides = [1, 1]} : vector<4x32xf32> to vector<2x32xf32>
    %426 = arith.truncf %425 : vector<2x32xf32> to vector<2x32xbf16>
    %427 = vector.extract_strided_slice %424 {offsets = [2, 0], sizes = [2, 32], strides = [1, 1]} : vector<4x32xf32> to vector<2x32xf32>
    %428 = arith.truncf %427 : vector<2x32xf32> to vector<2x32xbf16>
    %429 = vector.extract_strided_slice %11 {offsets = [28, 0], sizes = [2, 128], strides = [1, 1]} : vector<32x128xf32> to vector<2x128xf32>
    %cst_69 = arith.constant dense<0.000000e+00> : vector<2x128xf32>
    %430 = tpu.matmul %426, %17, %cst_69 {dimension_numbers = #tpu.dot_dimension_numbers<[1], [0], [0], [1], [0, 0, 1, 1], [], []>} : vector<2x32xbf16>, vector<32x128xbf16>, vector<2x128xf32> -> vector<2x128xf32>
    %431 = arith.addf %429, %430 : vector<2x128xf32>
    %432 = vector.extract_strided_slice %16 {offsets = [2, 0], sizes = [2, 128], strides = [1, 1]} : vector<32x128xf32> to vector<2x128xf32>
    %cst_70 = arith.constant dense<0.000000e+00> : vector<2x128xf32>
    %433 = tpu.matmul %428, %18, %cst_70 {dimension_numbers = #tpu.dot_dimension_numbers<[1], [0], [0], [1], [0, 0, 1, 1], [], []>} : vector<2x32xbf16>, vector<32x128xbf16>, vector<2x128xf32> -> vector<2x128xf32>
    %434 = arith.addf %432, %433 : vector<2x128xf32>
    %435 = tpu.concatenate %431, %434 in 0 : vector<2x128xf32>, vector<2x128xf32> -> vector<4x128xf32>
    %436 = arith.mulf %435, %27 : vector<4x128xf32>
    %437 = arith.negf %436 : vector<4x128xf32>
    %438 = math.exp %437 : vector<4x128xf32>
    %cst_71 = arith.constant 1.000000e+00 : f32
    %439 = vector.broadcast %cst_71 : f32 to vector<4x128xf32>
    %440 = arith.addf %439, %438 : vector<4x128xf32>
    %441 = arith.divf %439, %440 : vector<4x128xf32>
    %442 = arith.mulf %441, %27 : vector<4x128xf32>
    %443 = arith.addf %442, %30 : vector<4x128xf32>
    %444 = vector.extract_strided_slice %443 {offsets = [0, 0], sizes = [4, 32], strides = [1, 1]} : vector<4x128xf32> to vector<4x32xf32>
    %445 = vector.extract_strided_slice %443 {offsets = [0, 32], sizes = [4, 32], strides = [1, 1]} : vector<4x128xf32> to vector<4x32xf32>
    %446 = vector.extract_strided_slice %443 {offsets = [0, 64], sizes = [4, 32], strides = [1, 1]} : vector<4x128xf32> to vector<4x32xf32>
    %447 = vector.extract_strided_slice %443 {offsets = [0, 96], sizes = [4, 32], strides = [1, 1]} : vector<4x128xf32> to vector<4x32xf32>
    %448 = arith.mulf %445, %422 : vector<4x32xf32>
    %449 = arith.mulf %444, %446 : vector<4x32xf32>
    %450 = arith.addf %448, %449 : vector<4x32xf32>
    %451 = math.tanh %450 : vector<4x32xf32>
    %452 = arith.mulf %447, %451 : vector<4x32xf32>
    %453 = vector.extract_strided_slice %452 {offsets = [0, 0], sizes = [2, 32], strides = [1, 1]} : vector<4x32xf32> to vector<2x32xf32>
    %454 = arith.truncf %453 : vector<2x32xf32> to vector<2x32xbf16>
    %455 = vector.extract_strided_slice %452 {offsets = [2, 0], sizes = [2, 32], strides = [1, 1]} : vector<4x32xf32> to vector<2x32xf32>
    %456 = arith.truncf %455 : vector<2x32xf32> to vector<2x32xbf16>
    %457 = vector.extract_strided_slice %11 {offsets = [30, 0], sizes = [2, 128], strides = [1, 1]} : vector<32x128xf32> to vector<2x128xf32>
    %cst_72 = arith.constant dense<0.000000e+00> : vector<2x128xf32>
    %458 = tpu.matmul %454, %17, %cst_72 {dimension_numbers = #tpu.dot_dimension_numbers<[1], [0], [0], [1], [0, 0, 1, 1], [], []>} : vector<2x32xbf16>, vector<32x128xbf16>, vector<2x128xf32> -> vector<2x128xf32>
    %459 = arith.addf %457, %458 : vector<2x128xf32>
    %460 = vector.extract_strided_slice %16 {offsets = [0, 0], sizes = [2, 128], strides = [1, 1]} : vector<32x128xf32> to vector<2x128xf32>
    %cst_73 = arith.constant dense<0.000000e+00> : vector<2x128xf32>
    %461 = tpu.matmul %456, %18, %cst_73 {dimension_numbers = #tpu.dot_dimension_numbers<[1], [0], [0], [1], [0, 0, 1, 1], [], []>} : vector<2x32xbf16>, vector<32x128xbf16>, vector<2x128xf32> -> vector<2x128xf32>
    %462 = arith.addf %460, %461 : vector<2x128xf32>
    %463 = tpu.concatenate %459, %462 in 0 : vector<2x128xf32>, vector<2x128xf32> -> vector<4x128xf32>
    %464 = arith.mulf %463, %27 : vector<4x128xf32>
    %465 = arith.negf %464 : vector<4x128xf32>
    %466 = math.exp %465 : vector<4x128xf32>
    %cst_74 = arith.constant 1.000000e+00 : f32
    %467 = vector.broadcast %cst_74 : f32 to vector<4x128xf32>
    %468 = arith.addf %467, %466 : vector<4x128xf32>
    %469 = arith.divf %467, %468 : vector<4x128xf32>
    %470 = arith.mulf %469, %27 : vector<4x128xf32>
    %471 = arith.addf %470, %30 : vector<4x128xf32>
    %472 = vector.extract_strided_slice %471 {offsets = [0, 0], sizes = [4, 32], strides = [1, 1]} : vector<4x128xf32> to vector<4x32xf32>
    %473 = vector.extract_strided_slice %471 {offsets = [0, 32], sizes = [4, 32], strides = [1, 1]} : vector<4x128xf32> to vector<4x32xf32>
    %474 = vector.extract_strided_slice %471 {offsets = [0, 64], sizes = [4, 32], strides = [1, 1]} : vector<4x128xf32> to vector<4x32xf32>
    %475 = vector.extract_strided_slice %471 {offsets = [0, 96], sizes = [4, 32], strides = [1, 1]} : vector<4x128xf32> to vector<4x32xf32>
    %476 = arith.mulf %473, %450 : vector<4x32xf32>
    %477 = arith.mulf %472, %474 : vector<4x32xf32>
    %478 = arith.addf %476, %477 : vector<4x32xf32>
    %479 = math.tanh %478 : vector<4x32xf32>
    %480 = arith.mulf %475, %479 : vector<4x32xf32>
    %c0_75 = arith.constant 0 : index
    %c0_76 = arith.constant 0 : index
    %481 = vector.load %arg10[%c0_75, %c0_76] : memref<4x32xf32, #tpu.memory_space<vmem>>, vector<4x32xf32>
    tpu.vector_store %arg10[%c0_75, %c0_76], %480 {strides = array<i32>} : memref<4x32xf32, #tpu.memory_space<vmem>>, vector<4x32xf32>,
    %c0_77 = arith.constant 0 : index
    %c0_78 = arith.constant 0 : index
    %482 = vector.load %arg11[%c0_77, %c0_78] : memref<4x32xf32, #tpu.memory_space<vmem>>, vector<4x32xf32>
    tpu.vector_store %arg11[%c0_77, %c0_78], %478 {strides = array<i32>} : memref<4x32xf32, #tpu.memory_space<vmem>>, vector<4x32xf32>,
    %c0_i32_79 = arith.constant 0 : i32
    %483 = arith.cmpi eq, %arg0, %c0_i32_79 : i32
    %484 = arith.extui %483 : i1 to i32
    %c0_i32_80 = arith.constant 0 : i32
    %485 = arith.cmpi ne, %484, %c0_i32_80 : i32
    scf.if %485 {
      %486 = vector.extract_strided_slice %480 {offsets = [0, 0], sizes = [2, 32], strides = [1, 1]} : vector<4x32xf32> to vector<2x32xf32>
      %487 = vector.extract_strided_slice %480 {offsets = [2, 0], sizes = [2, 32], strides = [1, 1]} : vector<4x32xf32> to vector<2x32xf32>
      %cst_81 = arith.constant 0.000000e+00 : f32
      %488 = vector.broadcast %cst_81 : f32 to vector<2x64xf32>
      %489 = tpu.concatenate %486, %487, %488 in 1 : vector<2x32xf32>, vector<2x32xf32>, vector<2x64xf32> -> vector<2x128xf32>
      %c0_82 = arith.constant 0 : index
      %c0_83 = arith.constant 0 : index
      %490 = vector.load %arg9[%c0_82, %c0_83] : memref<2x128xf32, #tpu.memory_space<vmem>>, vector<2x128xf32>
      tpu.vector_store %arg9[%c0_82, %c0_83], %489 {strides = array<i32>} : memref<2x128xf32, #tpu.memory_space<vmem>>, vector<2x128xf32>,
    } else {
    }
    return
  }
  func.func @transform_0(%arg0: i32) -> (i32, i32, i32) {
    %c0_i32 = arith.constant 0 : i32
    %c0_i32_0 = arith.constant 0 : i32
    %c0_i32_1 = arith.constant 0 : i32
    return %arg0, %c0_i32, %c0_i32_0 : i32, i32, i32
  }
  func.func @transform_1(%arg0: i32) -> (i32, i32, i32) {
    %c0_i32 = arith.constant 0 : i32
    %0 = arith.subi %c0_i32, %arg0 : i32
    %c0_i32_0 = arith.constant 0 : i32
    %c0_i32_1 = arith.constant 0 : i32
    %c0_i32_2 = arith.constant 0 : i32
    return %0, %c0_i32_0, %c0_i32_1 : i32, i32, i32
  }
  func.func @transform_2(%arg0: i32) -> (i32, i32) {
    %c0_i32 = arith.constant 0 : i32
    %c0_i32_0 = arith.constant 0 : i32
    %c0_i32_1 = arith.constant 0 : i32
    return %c0_i32, %c0_i32_0 : i32, i32
  }
  func.func @transform_3(%arg0: i32) -> (i32, i32) {
    %c0_i32 = arith.constant 0 : i32
    %c0_i32_0 = arith.constant 0 : i32
    %c0_i32_1 = arith.constant 0 : i32
    return %c0_i32, %c0_i32_0 : i32, i32
  }
  func.func @transform_4(%arg0: i32) -> (i32, i32) {
    %c0_i32 = arith.constant 0 : i32
    %c0_i32_0 = arith.constant 0 : i32
    %c0_i32_1 = arith.constant 0 : i32
    return %c0_i32, %c0_i32_0 : i32, i32
  }
  func.func @transform_5(%arg0: i32) -> (i32, i32) {
    %c0_i32 = arith.constant 0 : i32
    %c0_i32_0 = arith.constant 0 : i32
    %c0_i32_1 = arith.constant 0 : i32
    return %c0_i32, %c0_i32_0 : i32, i32
  }
  func.func @transform_6(%arg0: i32) -> (i32, i32) {
    %c0_i32 = arith.constant 0 : i32
    %c0_i32_0 = arith.constant 0 : i32
    %c0_i32_1 = arith.constant 0 : i32
    return %c0_i32, %c0_i32_0 : i32, i32
  }
  func.func @transform_7(%arg0: i32) -> (i32, i32) {
    %c0_i32 = arith.constant 0 : i32
    %c0_i32_0 = arith.constant 0 : i32
    %c0_i32_1 = arith.constant 0 : i32
    return %c0_i32, %c0_i32_0 : i32, i32
  }
  func.func @transform_8(%arg0: i32) -> (i32, i32) {
    %c0_i32 = arith.constant 0 : i32
    %c0_i32_0 = arith.constant 0 : i32
    %c0_i32_1 = arith.constant 0 : i32
    return %c0_i32, %c0_i32_0 : i32, i32
  }
}

</mosaic_0001>

<bundles_post_ra>
// kernel: tpu_custom_call.1
= control target key start
LH: loop header
LB: loop body
LE: loop exit
PB: predicated region body
PF: predicated region fallthrough
CT: control target
= control target key end

     0   :  { %13 = vsyncpa [#allocation5], 0  ;;  %s4036_s0 = inlined_call_operand.hbm [shape: bf16[16,2,16], index: 0, kind: input, shape index: {}]   ;;  %s4037_s1 = inlined_call_operand.hbm [shape: bf16[16,2,16], index: 1, kind: input, shape index: {}]   ;;  %s4038_s2 = inlined_call_operand.hbm [shape: bf16[16,128], index: 2, kind: input, shape index: {}]   ;;  %s4039_s3 = inlined_call_operand.hbm [shape: bf16[16,128], index: 3, kind: input, shape index: {}]   ;;  %s4040_s4 = inlined_call_operand.hbm [shape: bf16[32,128], index: 4, kind: input, shape index: {}]   ;;  %s4041_s5 = inlined_call_operand.vmem [shape: bf16[32,128], index: 5, kind: input, shape index: {}]   ;;  %s4042_s6 = inlined_call_operand.vmem [shape: f32[1,128], index: 6, kind: input, shape index: {}]   ;;  %s4043_s7 = inlined_call_operand.vmem [shape: f32[1,128], index: 7, kind: input, shape index: {}]   ;;  %s4044_s8 = inlined_call_operand.hbm [shape: f32[2,128], index: 8, kind: output, shape index: {}]  }
   0x1   :  { %14 = vsyncpa [#allocation8], 0 }
   0x2   :  { %15 = vsyncpa [#allocation11], 0 }
   0x3   :  { %16 = vsyncpa [#allocation6], 0  ;;  %s3385_s27 = smov [#allocation7]   ;;  %s3245_s9 = scalar_lea.hbm %s4037_s1, 256 }
   0x4   :  { %s38_s28 = sshll.u32 %s3385_s27, 4  ;;  %p3246_p0 = scmp.ne.s32.totalorder %s4037_s1, %s3245_s9  ;;  %s39_s28 = int_to_ptr.vmem [resolvable:$true] %s38_s28 }
   0x5   :  { %p3249_p1 = scmp.lt.u32.totalorder %s3245_s9, %s4037_s1 }
   0x7   :  { %p3251_p2 = pnand %p3249_p1, %p3246_p0 }
   0x9   :  { %3254 = shalt.err (!%p3251_p2)
}
   0xa   :  { %s3255_s14 = scalar_lea.vmem %s39_s28, 256  ;;  %p3260_p4 = scmp.lt.s32.totalorder %s39_s28, %s39_s28 }
   0xb   :  { %p3256_p3 = scmp.ne.s32.totalorder %s39_s28, %s3255_s14  ;;  %p3261_p5 = scmp.lt.s32.totalorder %s3255_s14, %s3255_s14 }
   0xd   :  { %p3262_p6 = por %p3261_p5, %p3260_p4 }
   0xf   :  { %p3263_p7 = pnand %p3262_p6, %p3256_p3 }
  0x11   :  { %3266 = shalt.err (!%p3263_p7)
}
  0x12   :  { %s3386_s15 = smov 16   ;;  %s3387_s16 = smov 1  }
  0x13   :  { %44 = dma.hbm_to_vmem [thread:$0]  %s4037_s1, 256, %s39_s28, [#allocation8], %s3386_s15, %s3386_s15, %s3387_s16  }
  0x14   :  { %s3388_s19 = smov [#allocation10]   ;;  %s3389_s21 = smov [#allocation4]  }
  0x15   :  { %s62_s20 = sshll.u32 %s3388_s19, 4  ;;  %s22_s22 = sshll.u32 %s3389_s21, 4  ;;  %s63_s20 = int_to_ptr.vmem [resolvable:$true] %s62_s20  ;;  %s23_s22 = int_to_ptr.vmem [resolvable:$true] %s22_s22 }
  0x16   :  { %s3267_s25 = scalar_lea.hbm %s4039_s3, 128 }
  0x17   :  { %p3268_p8 = scmp.ne.s32.totalorder %s4039_s3, %s3267_s25  ;;  %p3271_p9 = scmp.lt.u32.totalorder %s3267_s25, %s4039_s3 }
  0x19   :  { %p3273_p10 = pnand %p3271_p9, %p3268_p8 }
  0x1b   :  { %3276 = shalt.err (!%p3273_p10)
}
  0x1c   :  { %s3277_s1 = scalar_lea.vmem %s63_s20, 128  ;;  %p3282_p12 = scmp.lt.s32.totalorder %s63_s20, %s63_s20 }
  0x1d   :  { %p3278_p11 = scmp.ne.s32.totalorder %s63_s20, %s3277_s1  ;;  %p3283_p13 = scmp.lt.s32.totalorder %s3277_s1, %s3277_s1 }
  0x1f   :  { %p3284_p0 = por %p3283_p13, %p3282_p12 }
  0x21   :  { %p3285_p1 = pnand %p3284_p0, %p3278_p11 }
  0x23   :  { %3288 = shalt.err (!%p3285_p1)
}
  0x24   :  { %s3390_s28 = smov 64   ;;  %s3391_s9 = smov 4  }
  0x25   :  { %68 = dma.hbm_to_vmem [thread:$0]  %s4039_s3, 128, %s63_s20, [#allocation11], %s3390_s28, %s3390_s28, %s3391_s9  }
  0x26   :  { %s3289_s14 = scalar_lea.hbm %s4036_s0, 256 }
  0x27   :  { %p3290_p2 = scmp.ne.s32.totalorder %s4036_s0, %s3289_s14  ;;  %p3293_p3 = scmp.lt.u32.totalorder %s3289_s14, %s4036_s0 }
  0x29   :  { %p3295_p4 = pnand %p3293_p3, %p3290_p2 }
  0x2b   :  { %3298 = shalt.err (!%p3295_p4)
}
  0x2c   :  { %s3299_s23 = scalar_lea.vmem %s23_s22, 256  ;;  %p3304_p6 = scmp.lt.s32.totalorder %s23_s22, %s23_s22 }
  0x2d   :  { %p3300_p5 = scmp.ne.s32.totalorder %s23_s22, %s3299_s23  ;;  %p3305_p7 = scmp.lt.s32.totalorder %s3299_s23, %s3299_s23 }
  0x2f   :  { %p3306_p8 = por %p3305_p7, %p3304_p6 }
  0x31   :  { %p3307_p9 = pnand %p3306_p8, %p3300_p5 }
  0x33   :  { %3310 = shalt.err (!%p3307_p9)
}
  0x34   :  { %28 = dma.hbm_to_vmem [thread:$0]  %s4036_s0, 256, %s23_s22, [#allocation5], %s3386_s15, %s3386_s15, %s3387_s16  }
  0x35   :  { %s3392_s24 = smov [#allocation9]   ;;  %s3393_s26 = smov [#allocation12]  }
  0x36   :  { %s50_s25 = sshll.u32 %s3392_s24, 4  ;;  %s74_s27 = sshll.u32 %s3393_s26, 4  ;;  %s51_s25 = int_to_ptr.vmem [resolvable:$true] %s50_s25  ;;  %s75_s27 = int_to_ptr.vmem [resolvable:$true] %s74_s27 }
  0x37   :  { %s3311_s1 = scalar_lea.hbm %s4038_s2, 128 }
  0x38   :  { %p3312_p10 = scmp.ne.s32.totalorder %s4038_s2, %s3311_s1  ;;  %p3315_p11 = scmp.lt.u32.totalorder %s3311_s1, %s4038_s2 }
  0x3a   :  { %p3317_p12 = pnand %p3315_p11, %p3312_p10 }
  0x3c   :  { %3320 = shalt.err (!%p3317_p12)
}
  0x3d   :  { %s3321_s0 = scalar_lea.vmem %s51_s25, 128  ;;  %p3326_p0 = scmp.lt.s32.totalorder %s51_s25, %s51_s25 }
  0x3e   :  { %p3322_p13 = scmp.ne.s32.totalorder %s51_s25, %s3321_s0  ;;  %p3327_p1 = scmp.lt.s32.totalorder %s3321_s0, %s3321_s0 }
  0x40   :  { %p3328_p2 = por %p3327_p1, %p3326_p0 }
  0x42   :  { %p3329_p3 = pnand %p3328_p2, %p3322_p13 }
  0x44   :  { %3332 = shalt.err (!%p3329_p3)
}
  0x45   :  { %56 = dma.hbm_to_vmem [thread:$0]  %s4038_s2, 128, %s51_s25, [#allocation8], %s3390_s28, %s3390_s28, %s3391_s9  }
  0x46   :  { %s3333_s17 = scalar_lea.hbm %s4040_s4, 256 }
  0x47   :  { %p3334_p4 = scmp.ne.s32.totalorder %s4040_s4, %s3333_s17  ;;  %p3337_p5 = scmp.lt.u32.totalorder %s3333_s17, %s4040_s4 }
  0x49   :  { %p3339_p6 = pnand %p3337_p5, %p3334_p4 }
  0x4b   :  { %3342 = shalt.err (!%p3339_p6)
}
  0x4c   :  { %s3343_s3 = scalar_lea.vmem %s75_s27, 256  ;;  %p3348_p8 = scmp.lt.s32.totalorder %s75_s27, %s75_s27 }
  0x4d   :  { %p3344_p7 = scmp.ne.s32.totalorder %s75_s27, %s3343_s3  ;;  %p3349_p9 = scmp.lt.s32.totalorder %s3343_s3, %s3343_s3 }
  0x4f   :  { %p3350_p10 = por %p3349_p9, %p3348_p8 }
  0x51   :  { %p3351_p11 = pnand %p3350_p10, %p3344_p7 }
  0x53   :  { %3354 = shalt.err (!%p3351_p11)
}
  0x54   :  { %80 = dma.hbm_to_vmem [thread:$0]  %s4040_s4, 256, %s75_s27, [#allocation11], %s3390_s28, %s3390_s28, %s3391_s9  }
  0x55   :  { %3377 = dma.done.wait [#allocation5], 256  }
  0x56   :  { %3378 = vsyncadd [#allocation5], 4294967040 }
  0x57   :  { %3379 = dma.done.wait [#allocation8], 384  }
  0x58   :  { %3380 = vsyncadd [#allocation8], 4294966912 }
  0x59   :  { %3381 = dma.done.wait [#allocation11], 384  }
  0x5a   :  { %3382 = vsyncadd [#allocation11], 4294966912  ;;  %v176_v0 = vlaneseq  ;;  %v3394_v1 = vmov 1966171168   ;;  %vm109_vm0 = vcmask 257024   ;;  %v3395_v3 = vmov 0.0  }
  0x5b   :  { %v174_v2 = vunpack.c.l.s4 %v3394_v1  ;;  %110 = vst.msk [vmem:[#allocation2] sm:$0xf] %vm109_vm0, %v3395_v3  ;;  %111 = vst.msk [vmem:[#allocation3] sm:$0xf] %vm109_vm0, %v3395_v3  ;;  %v3139_v6 = vld [vmem:[#allocation10] sm:$0xff]   ;;  %v3140_v7 = vld [vmem:[#allocation9] sm:$0xff]  }
  0x5c   :  { %v177_v5 = vshrl.u32 %v176_v0, 7  ;;  %2861 = vmatprep.subr.bf16.mxu1 %v3139_v6  ;;  %v112_v9 = vld [vmem:[#allocation4] sm:$0x1]  ;;  %v113_v10 = vld [vmem:[#allocation4 + $0x1] sm:$0x1]  ;;  %2855 = vmatprep.subr.bf16.mxu0 %v3140_v7  ;;  %vm273_vm1 = vcmask 130048  }
  0x5d   :  { %v175_v4 = vunpack.c.0.s8 %v174_v2  ;;  %v114_v11 = vld [vmem:[#allocation4 + $0x2] sm:$0x1]  ;;  %2862 = vmatpush3.bf16.msra.mxu1 %v3139_v6  ;;  %v115_v12 = vld [vmem:[#allocation4 + $0x3] sm:$0x1]  ;;  %v116_v13 = vld [vmem:[#allocation4 + $0x4] sm:$0x1]  ;;  %v169_v15 = vcombine.low %v112_v9, %v113_v10  ;;  %2856 = vmatpush3.bf16.msra.mxu0 %v3140_v7 }
  0x5e   :  { %v117_v14 = vld [vmem:[#allocation4 + $0x5] sm:$0x1]  ;;  %v118_v16 = vld [vmem:[#allocation4 + $0x6] sm:$0x1]  ;;  %v119_v17 = vld [vmem:[#allocation4 + $0x7] sm:$0x1]  ;;  %v170_v18 = vcombine.low %v114_v11, %v115_v12  ;;  %2875 = vmatprep.subr.bf16.mxu1 %v3395_v3  ;;  %2867 = vmatprep.subr.bf16.mxu0 %v3395_v3 }
  0x5f   :  { %v3526_v8 = vsub.s32 %v175_v4, %v177_v5  ;;  %v171_v19 = vcombine.low %v116_v13, %v117_v14  ;;  %v128_v20 = vld [vmem:[#allocation7] sm:$0x1]  ;;  %v172_v21 = vcombine.low %v118_v16, %v119_v17  ;;  %v129_v23 = vld [vmem:[#allocation7 + $0x1] sm:$0x1]  ;;  %v130_v24 = vld [vmem:[#allocation7 + $0x2] sm:$0x1] }
  0x60   :  { %v131_v25 = vld [vmem:[#allocation7 + $0x3] sm:$0x1]  ;;  %v132_v28 = vld [vmem:[#allocation7 + $0x4] sm:$0x1]  ;;  %v133_v29 = vld [vmem:[#allocation7 + $0x5] sm:$0x1]  ;;  %v354_v31 = vcombine.low %v128_v20, %v129_v23 }
  0x61   :  { %v179_v22 = vrot.slane %v169_v15, %v3526_v8  ;;  %v186_v26 = vrot.slane %v170_v18, %v3526_v8  ;;  %v193_v27 = vrot.slane %v171_v19, %v3526_v8  ;;  %v134_v30 = vld [vmem:[#allocation7 + $0x6] sm:$0x1]  ;;  %v355_v32 = vcombine.low %v130_v24, %v131_v25  ;;  %v135_v34 = vld [vmem:[#allocation7 + $0x7] sm:$0x1]  ;;  %v120_v36 = vld [vmem:[#allocation4 + $0x8] sm:$0x1] }
  0x62   :  { %v200_v33 = vrot.slane %v172_v21, %v3526_v8  ;;  %v356_v35 = vcombine.low %v132_v28, %v133_v29  ;;  %v121_v37 = vld [vmem:[#allocation4 + $0x9] sm:$0x1]  ;;  %v357_v39 = vcombine.low %v134_v30, %v135_v34  ;;  %v364_v40 = vrot.slane %v354_v31, %v3526_v8  ;;  %v122_v42 = vld [vmem:[#allocation4 + $0xa] sm:$0x1]  ;;  %v123_v43 = vld [vmem:[#allocation4 + $0xb] sm:$0x1] }
  0x63   :  { %v201_v38 = vcombine.low %v179_v22, %v186_v26  ;;  %v371_v41 = vrot.slane %v355_v32, %v3526_v8  ;;  %v124_v44 = vld [vmem:[#allocation4 + $0xc] sm:$0x1]  ;;  %v125_v47 = vld [vmem:[#allocation4 + $0xd] sm:$0x1]  ;;  %v126_v48 = vld [vmem:[#allocation4 + $0xe] sm:$0x1]  ;;  %v218_v50 = vcombine.low %v120_v36, %v121_v37  ;;  %v219_v51 = vcombine.low %v122_v42, %v123_v43 }
  0x64   :  { %v202_v45 = vcombine.low %v193_v27, %v200_v33  ;;  %v378_v46 = vrot.slane %v356_v35, %v3526_v8  ;;  %v127_v49 = vld [vmem:[#allocation4 + $0xf] sm:$0x1]  ;;  %v385_v53 = vrot.slane %v357_v39, %v3526_v8  ;;  %v220_v55 = vcombine.low %v124_v44, %v125_v47  ;;  %v136_v56 = vld [vmem:[#allocation7 + $0x8] sm:$0x1]  ;;  %v137_v57 = vld [vmem:[#allocation7 + $0x9] sm:$0x1] }
  0x65   :  { %v209_v52 = vrot.slane %v201_v38, %v3526_v8  ;;  %v386_v54 = vcombine.low %v364_v40, %v371_v41  ;;  %v138_v58 = vld [vmem:[#allocation7 + $0xa] sm:$0x1]  ;;  %v221_v60 = vcombine.low %v126_v48, %v127_v49  ;;  %v228_v61 = vrot.slane %v218_v50, %v3526_v8  ;;  %v139_v63 = vld [vmem:[#allocation7 + $0xb] sm:$0x1]  ;;  %v140_v1 = vld [vmem:[#allocation7 + $0xc] sm:$0x1] }
  0x66   :  { %v216_v59 = vrot.slane %v202_v45, %v3526_v8  ;;  %v235_v62 = vrot.slane %v219_v51, %v3526_v8  ;;  %v141_v2 = vld [vmem:[#allocation7 + $0xd] sm:$0x1]  ;;  %v387_v4 = vcombine.low %v378_v46, %v385_v53  ;;  %v242_v6 = vrot.slane %v220_v55, %v3526_v8  ;;  %v142_v7 = vld [vmem:[#allocation7 + $0xe] sm:$0x1]  ;;  %v143_v9 = vld [vmem:[#allocation7 + $0xf] sm:$0x1] }
  0x67   :  { %v394_v5 = vrot.slane %v386_v54, %v3526_v8  ;;  %v403_v10 = vcombine.low %v136_v56, %v137_v57  ;;  %v249_v12 = vrot.slane %v221_v60, %v3526_v8  ;;  %v404_v14 = vcombine.low %v138_v58, %v139_v63  ;;  %v3554_v28 = vld [vmem:[#allocation12] sm:$0xff]   ;;  %v3562_v32 = vld [vmem:[%s4041_s5] sm:$0xff]   ;;  %v3575_v36 = vld [vmem:[%s4041_s5 + $0x8] sm:$0xff]   ;;  %s3400_s12 = smov [#allocation13]  }
  0x68   :  { %v217_v11 = vcombine.low %v209_v52, %v216_v59  ;;  %v250_v13 = vcombine.low %v228_v61, %v235_v62  ;;  %v401_v15 = vrot.slane %v387_v4, %v3526_v8  ;;  %v405_v16 = vcombine.low %v140_v1, %v141_v2  ;;  %v528_v33 = vld [vmem:[#allocation2] sm:$0xf]  ;;  %s2680_s13 = sshll.u32 %s3400_s12, 4  ;;  %s2681_s13 = int_to_ptr.vmem [resolvable:$true] %s2680_s13 }
  0x69   :  { %v406_v17 = vcombine.low %v142_v7, %v143_v9  ;;  %v413_v18 = vrot.slane %v403_v10, %v3526_v8  ;;  %v251_v19 = vcombine.low %v242_v6, %v249_v12  ;;  %v420_v21 = vrot.slane %v404_v14, %v3526_v8  ;;  %v3565_v35 = vld [vmem:[#allocation12 + $0x8] sm:$0xff]   ;;  %s3355_s0 = scalar_lea.vmem %s2681_s13, 32  ;;  %p3360_p13 = scmp.lt.s32.totalorder %s2681_s13, %s2681_s13 }
  0x6a   :  { %2857 = vmatprep.mubr.msk.bf16.mxu0 %vm273_vm1, %v217_v11  ;;  %v258_v20 = vrot.slane %v250_v13, %v3526_v8  ;;  %v402_v22 = vcombine.low %v394_v5, %v401_v15  ;;  %v427_v23 = vrot.slane %v405_v16, %v3526_v8  ;;  %vm3396_vm2 = vmmov 0   ;;  %v2693_v38 = vld [vmem:[%s4042_s6] ss:$0 sm:$0xff]  ;;  %s3398_s6 = smov 32   ;;  %p3356_p12 = scmp.ne.s32.totalorder %s2681_s13, %s3355_s0 }
  0x6b   :  { %v434_v24 = vrot.slane %v406_v17, %v3526_v8  ;;  %v265_v25 = vrot.slane %v251_v19, %v3526_v8  ;;  %v435_v26 = vcombine.low %v413_v18, %v420_v21  ;;  %vm543_vm3 = vcmask 261120   ;;  %v2697_v40 = vld [vmem:[%s4043_s7] ss:$0 sm:$0xff]  ;;  %v529_v19 = vld [vmem:[#allocation3] sm:$0xf]  ;;  %p3361_p0 = scmp.lt.s32.totalorder %s3355_s0, %s3355_s0 }
  0x6c   :  { %2863 = vmatprep.mubr.msk.bf16.mxu1 %vm273_vm1, %v402_v22  ;;  %v522_v53 = vand.u32 127, %v176_v0  ;;  %vm652_vm7 = vcmask 1041408   ;;  %v3397_v6 = vmov 1.0   ;;  %vm2671_vm8 = vcmask 523264  }
  0x6d   :  { %v436_v27 = vcombine.low %v427_v23, %v434_v24  ;;  %v266_v29 = vcombine.low %v258_v20, %v265_v25  ;;  %v443_v30 = vrot.slane %v435_v26, %v3526_v8  ;;  %p3362_p1 = por %p3361_p0, %p3360_p13 }
  0x6e   :  { %vm523_vm4 = vcmp.ge.s32.totalorder %v522_v53, 64  ;;  %vm524_vm5 = vcmp.lt.s32.totalorder %v522_v53, 96 }
  0x6f   :  { %v450_v31 = vrot.slane %v436_v27, %v3526_v8  ;;  %2858 = vmatmul.mubr.msk.bf16.vlgmr.msra.gmra.mrb[0].mxu0 %vm273_vm1, %v266_v29  ;;  %v530_v8 = vpack.c.bf16 %v528_v33, %v528_v33  ;;  %vm3619_vm6 = vmand %vm523_vm4, %vm524_vm5  ;;  %p3363_p2 = pnand %p3362_p1, %p3356_p12 }
  0x70   :  { %2868 = vmatpush3.bf16.msra.mxu0 %v3554_v28  ;;  %2871 = vmatprep.mubr.msk.bf16.mxu0 %vm3396_vm2, %v3395_v3  ;;  %v3629_v7 = vsel %vm3619_vm6, 2.0, %v3397_v6  ;;  %v3636_v16 = vsel %vm3619_vm6, -1.0, %v3395_v3 }
  0x71   :  { %v451_v34 = vcombine.low %v443_v30, %v450_v31  ;;  %2869 = vmatprep.subr.bf16.mxu0 %v3395_v3  ;;  %v589_v37 = vrot.slane %v530_v8, 1 }
  0x73   :  { %2864 = vmatmul.mubr.msk.bf16.vlgmr.msra.gmra.mrb[0].mxu1 %vm273_vm1, %v451_v34 }
  0x74   :  { %2876 = vmatpush3.bf16.msra.mxu1 %v3562_v32  ;;  %2879 = vmatprep.mubr.msk.bf16.mxu1 %vm3396_vm2, %v3395_v3 }
  0x75   :  { %2877 = vmatprep.subr.bf16.mxu1 %v3395_v3  ;;  %2870 = vmatpush3.bf16.msra.mxu0 %v3565_v35 }
  0x76   :  { %2883 = vmatprep.subr.bf16.mxu0 %v3395_v3 }
  0x78   :  { %2878 = vmatpush3.bf16.msra.mxu1 %v3575_v36  ;;  %2872 = vmatmul.mubr.msk.bf16.vlgmr.msra.gmra.mrb[4].mxu0 %vm543_vm3, %v530_v8 }
  0x79   :  { %2884 = vmatpush3.bf16.msra.mxu0 %v3554_v28  ;;  %2891 = vmatprep.subr.bf16.mxu1 %v3395_v3 }
  0x7a   :  { %2885 = vmatprep.subr.bf16.mxu0 %v3395_v3  ;;  %2887 = vmatprep.mubr.msk.bf16.mxu0 %vm3396_vm2, %v3395_v3 }
  0x7b   :  { %2880 = vmatmul.mubr.msk.bf16.vlgmr.msra.gmra.mrb[4].mxu1 %vm543_vm3, %v589_v37 }
  0x7c   :  { %2892 = vmatpush3.bf16.msra.mxu1 %v3562_v32  ;;  %2895 = vmatprep.mubr.msk.bf16.mxu1 %vm3396_vm2, %v3395_v3 }
  0x7d   :  { %2886 = vmatpush3.bf16.msra.mxu0 %v3565_v35  ;;  %2893 = vmatprep.subr.bf16.mxu1 %v3395_v3 }
  0x7e   :  { %2899 = vmatprep.subr.bf16.mxu0 %v3395_v3 }
  0x80   :  { %2894 = vmatpush3.bf16.msra.mxu1 %v3575_v36 }
  0x81   :  { %2907 = vmatprep.subr.bf16.mxu1 %v3395_v3 }
 0x142   :  { %v2859_v39 = vpop.f32.mrb[0].mxu0 }
 0x143   :  { %v3604_v41 = vadd.f32 %v2859_v39, %v2693_v38  ;;  %v314_v42 = vpop.f32.mrb[1].mxu0 }
 0x144   :  { %v2860_v43 = vpop.f32.mrb[2].mxu0  ;;  %v3623_v2 = vadd.f32 %v2693_v38, %v314_v42 }
 0x145   :  { %v3606_v45 = vadd.f32 %v2860_v43, %v2693_v38  ;;  %v317_v46 = vpop.f32.mrb[3].mxu0 }
 0x146   :  { %v2865_v44 = vpop.f32.mrb[0].mxu1  ;;  %v3610_v49 = vadd.f32 %v2693_v38, %v317_v46 }
 0x147   :  { %v3608_v47 = vadd.f32 %v2865_v44, %v2697_v40  ;;  %v498_v48 = vpop.f32.mrb[1].mxu1 }
 0x148   :  { %v3612_v50 = vadd.f32 %v2697_v40, %v498_v48  ;;  %v2866_v51 = vpop.f32.mrb[2].mxu1 }
 0x149   :  { %v501_v52 = vpop.f32.mrb[3].mxu1  ;;  %v3617_v60 = vadd.f32 %v2866_v51, %v2697_v40 }
 0x14a   :  { %v3615_v54 = vadd.f32 %v2697_v40, %v501_v52 }
 0x14b   :  { %v581_v55 = vpop.f32.mrb[4].mxu0 }
 0x14c   :  { %v2873_v56 = vpop.f32.mrb[5].mxu0  ;;  %v587_v5 = vadd.f32 %v581_v55, %v3623_v2 }
 0x14d   :  { %v584_v57 = vpop.f32.mrb[6].mxu0 }
 0x14e   :  { %v639_v58 = vpop.f32.mrb[4].mxu1  ;;  %v2874_v59 = vpop.f32.mrb[7].mxu0 }
 0x14f   :  { %v646_v61 = vrot.slane %v639_v58, 2  ;;  %v2881_v62 = vpop.f32.mrb[5].mxu1 }
 0x150   :  { %v642_v1 = vpop.f32.mrb[6].mxu1 }
 0x151   :  { %v648_v0 = vadd.f32 %v646_v61, %v3617_v60  ;;  %v2882_v4 = vpop.f32.mrb[7].mxu1 }
 0x153   :  { %v650_v9 = vrot.slane %v648_v0, 4 }
 0x155   :  { %v653_v10 = vsel %vm652_vm7, %v587_v5, %v650_v9 }
 0x156   :  { %v654_v11 = vmul.f32 %v653_v10, %v3629_v7 }
 0x158   :  { %v2707_v12 = vmul.f32 -1.442695, %v654_v11 }
 0x15a   :  { %3145 = vpow2.f32 %v2707_v12 }
 0x164   :  { %v3146_v13 = vpop.eup %3145 }
 0x165   :  { %v658_v14 = vadd.f32 1.0, %v3146_v13 }
 0x167   :  { %3147 = vrcp.f32 %v658_v14 }
 0x171   :  { %v3148_v15 = vpop.eup %3147 }
 0x172   :  { %v661_v17 = vmul.f32 %v3148_v15, %v3629_v7 }
 0x174   :  { %v662_v18 = vadd.f32 %v661_v17, %v3636_v16 }
 0x176   :  { %669 = vrot.lane.b32.xlu0 %v662_v18, %s3390_s28 }
 0x17a   :  { %664 = vrot.lane.b32.xlu0 %v529_v19, %s3398_s6 }
 0x1e8   :  { %v670_v20 = vpop.permute.xlu0 %669 }
 0x1e9   :  { %v672_v21 = vmul.f32 %v670_v20, %v662_v18 }
 0x1eb   :  { %674 = vrot.lane.b32.xlu1 %v672_v21, %s3398_s6 }
 0x1ec   :  { %v665_v22 = vpop.permute.xlu0 %664 }
 0x1ed   :  { %v667_v23 = vmul.f32 %v665_v22, %v662_v18 }
 0x25d   :  { %v675_v24 = vpop.permute.xlu1 %674 }
 0x25e   :  { %v677_v25 = vadd.f32 %v675_v24, %v667_v23 }
 0x260   :  { %3149 = vtanh.f32 %v677_v25 }
 0x26a   :  { %v3150_v26 = vpop.eup %3149 }
 0x26b   :  { %680 = vrot.lane.b32.xlu1 %v3150_v26, %s3390_s28 }
 0x2dd   :  { %v681_v27 = vpop.permute.xlu1 %680 }
 0x2de   :  { %v683_v29 = vmul.f32 %v681_v27, %v662_v18 }
 0x2e0   :  { %v684_v30 = vpack.c.bf16 %v683_v29, %v683_v29 }
 0x2e2   :  { %v735_v31 = vrot.slane %v684_v30, 1  ;;  %686 = vrot.lane.b32.xlu0 %v684_v30, %s3398_s6 }
 0x2e4   :  { %736 = vrot.lane.b32.xlu1 %v735_v31, %s3398_s6 }
 0x354   :  { %v687_v33 = vpop.permute.xlu0 %686 }
 0x355   :  { %2888 = vmatmul.mubr.msk.bf16.vlgmr.msra.gmra.mrb[8].mxu0 %vm543_vm3, %v687_v33 }
 0x356   :  { %v737_v34 = vpop.permute.xlu1 %736  ;;  %2900 = vmatpush3.bf16.msra.mxu0 %v3554_v28  ;;  %2903 = vmatprep.mubr.msk.bf16.mxu0 %vm3396_vm2, %v3395_v3 }
 0x357   :  { %2896 = vmatmul.mubr.msk.bf16.vlgmr.msra.gmra.mrb[8].mxu1 %vm543_vm3, %v737_v34  ;;  %2901 = vmatprep.subr.bf16.mxu0 %v3395_v3 }
 0x358   :  { %2908 = vmatpush3.bf16.msra.mxu1 %v3562_v32  ;;  %2911 = vmatprep.mubr.msk.bf16.mxu1 %vm3396_vm2, %v3395_v3 }
 0x359   :  { %2909 = vmatprep.subr.bf16.mxu1 %v3395_v3 }
 0x35a   :  { %2902 = vmatpush3.bf16.msra.mxu0 %v3565_v35 }
 0x35b   :  { %2915 = vmatprep.subr.bf16.mxu0 %v3395_v3 }
 0x35c   :  { %2910 = vmatpush3.bf16.msra.mxu1 %v3575_v36 }
 0x35d   :  { %2923 = vmatprep.subr.bf16.mxu1 %v3395_v3 }
 0x428   :  { %v725_v8 = vpop.f32.mrb[8].mxu0 }
 0x429   :  { %v732_v37 = vrot.slane %v725_v8, 6  ;;  %v2889_v38 = vpop.f32.mrb[9].mxu0 }
 0x42a   :  { %v728_v39 = vpop.f32.mrb[10].mxu0  ;;  %v775_v40 = vpop.f32.mrb[8].mxu1 }
 0x42b   :  { %v734_v42 = vadd.f32 %v732_v37, %v3623_v2  ;;  %v782_v43 = vrot.slane %v775_v40, 4  ;;  %v2890_v44 = vpop.f32.mrb[11].mxu0  ;;  %v2897_v46 = vpop.f32.mrb[9].mxu1 }
 0x42c   :  { %v778_v48 = vpop.f32.mrb[10].mxu1 }
 0x42d   :  { %v784_v51 = vadd.f32 %v782_v43, %v3617_v60  ;;  %v2898_v52 = vpop.f32.mrb[11].mxu1  ;;  %v786_v53 = vrot.slane %v734_v42, 2 }
 0x42f   :  { %v789_v55 = vrot.slane %v784_v51, 2 }
 0x431   :  { %v791_v56 = vsel %vm652_vm7, %v786_v53, %v789_v55 }
 0x432   :  { %v792_v57 = vmul.f32 %v791_v56, %v3629_v7 }
 0x434   :  { %v2710_v58 = vmul.f32 -1.442695, %v792_v57 }
 0x436   :  { %3151 = vpow2.f32 %v2710_v58 }
 0x440   :  { %v3152_v59 = vpop.eup %3151 }
 0x441   :  { %v796_v61 = vadd.f32 1.0, %v3152_v59 }
 0x443   :  { %3153 = vrcp.f32 %v796_v61 }
 0x44d   :  { %v3154_v62 = vpop.eup %3153 }
 0x44e   :  { %v799_v63 = vmul.f32 %v3154_v62, %v3629_v7 }
 0x450   :  { %v800_v1 = vadd.f32 %v799_v63, %v3636_v16 }
 0x452   :  { %803 = vrot.lane.b32.xlu0 %v800_v1, %s3390_s28  ;;  %v801_v5 = vmul.f32 %v800_v1, %v677_v25 }
 0x4c4   :  { %v804_v0 = vpop.permute.xlu0 %803 }
 0x4c5   :  { %v806_v4 = vmul.f32 %v804_v0, %v800_v1 }
 0x4c7   :  { %808 = vrot.lane.b32.xlu1 %v806_v4, %s3398_s6 }
 0x539   :  { %v809_v6 = vpop.permute.xlu1 %808 }
 0x53a   :  { %v811_v9 = vadd.f32 %v809_v6, %v801_v5 }
 0x53c   :  { %3155 = vtanh.f32 %v811_v9 }
 0x546   :  { %v3156_v10 = vpop.eup %3155 }
 0x547   :  { %814 = vrot.lane.b32.xlu0 %v3156_v10, %s3390_s28 }
 0x5b9   :  { %v815_v11 = vpop.permute.xlu0 %814 }
 0x5ba   :  { %v817_v12 = vmul.f32 %v815_v11, %v800_v1 }
 0x5bc   :  { %v818_v13 = vpack.c.bf16 %v817_v12, %v817_v12 }
 0x5be   :  { %v869_v14 = vrot.slane %v818_v13, 1  ;;  %820 = vrot.lane.b32.xlu1 %v818_v13, %s3398_s6 }
 0x5c0   :  { %870 = vrot.lane.b32.xlu0 %v869_v14, %s3398_s6 }
 0x630   :  { %v821_v15 = vpop.permute.xlu1 %820 }
 0x631   :  { %2904 = vmatmul.mubr.msk.bf16.vlgmr.msra.gmra.mrb[12].mxu0 %vm543_vm3, %v821_v15 }
 0x632   :  { %v871_v17 = vpop.permute.xlu0 %870  ;;  %2916 = vmatpush3.bf16.msra.mxu0 %v3554_v28  ;;  %2919 = vmatprep.mubr.msk.bf16.mxu0 %vm3396_vm2, %v3395_v3 }
 0x633   :  { %2912 = vmatmul.mubr.msk.bf16.vlgmr.msra.gmra.mrb[12].mxu1 %vm543_vm3, %v871_v17  ;;  %2917 = vmatprep.subr.bf16.mxu0 %v3395_v3 }
 0x634   :  { %2924 = vmatpush3.bf16.msra.mxu1 %v3562_v32  ;;  %2927 = vmatprep.mubr.msk.bf16.mxu1 %vm3396_vm2, %v3395_v3 }
 0x635   :  { %2925 = vmatprep.subr.bf16.mxu1 %v3395_v3 }
 0x636   :  { %2918 = vmatpush3.bf16.msra.mxu0 %v3565_v35 }
 0x637   :  { %2931 = vmatprep.subr.bf16.mxu0 %v3395_v3 }
 0x638   :  { %2926 = vmatpush3.bf16.msra.mxu1 %v3575_v36 }
 0x639   :  { %2939 = vmatprep.subr.bf16.mxu1 %v3395_v3 }
 0x704   :  { %v859_v18 = vpop.f32.mrb[12].mxu0 }
 0x705   :  { %v866_v19 = vrot.slane %v859_v18, 4  ;;  %v2905_v20 = vpop.f32.mrb[13].mxu0 }
 0x706   :  { %v862_v21 = vpop.f32.mrb[14].mxu0  ;;  %v909_v22 = vpop.f32.mrb[12].mxu1 }
 0x707   :  { %v868_v23 = vadd.f32 %v866_v19, %v3623_v2  ;;  %v916_v24 = vrot.slane %v909_v22, 6  ;;  %v2906_v25 = vpop.f32.mrb[15].mxu0  ;;  %v2913_v26 = vpop.f32.mrb[13].mxu1 }
 0x708   :  { %v912_v27 = vpop.f32.mrb[14].mxu1 }
 0x709   :  { %v920_v29 = vrot.slane %v868_v23, 4  ;;  %v918_v30 = vadd.f32 %v916_v24, %v3617_v60  ;;  %v2914_v31 = vpop.f32.mrb[15].mxu1 }
 0x70b   :  { %v922_v33 = vsel %vm652_vm7, %v920_v29, %v918_v30 }
 0x70c   :  { %v923_v34 = vmul.f32 %v922_v33, %v3629_v7 }
 0x70e   :  { %v2713_v8 = vmul.f32 -1.442695, %v923_v34 }
 0x710   :  { %3157 = vpow2.f32 %v2713_v8 }
 0x71a   :  { %v3158_v37 = vpop.eup %3157 }
 0x71b   :  { %v927_v38 = vadd.f32 1.0, %v3158_v37 }
 0x71d   :  { %3159 = vrcp.f32 %v927_v38 }
 0x727   :  { %v3160_v39 = vpop.eup %3159 }
 0x728   :  { %v930_v40 = vmul.f32 %v3160_v39, %v3629_v7 }
 0x72a   :  { %v931_v42 = vadd.f32 %v930_v40, %v3636_v16 }
 0x72c   :  { %934 = vrot.lane.b32.xlu1 %v931_v42, %s3390_s28  ;;  %v932_v46 = vmul.f32 %v931_v42, %v811_v9 }
 0x79e   :  { %v935_v43 = vpop.permute.xlu1 %934 }
 0x79f   :  { %v937_v44 = vmul.f32 %v935_v43, %v931_v42 }
 0x7a1   :  { %939 = vrot.lane.b32.xlu0 %v937_v44, %s3398_s6 }
 0x813   :  { %v940_v48 = vpop.permute.xlu0 %939 }
 0x814   :  { %v942_v51 = vadd.f32 %v940_v48, %v932_v46 }
 0x816   :  { %3161 = vtanh.f32 %v942_v51 }
 0x820   :  { %v3162_v52 = vpop.eup %3161 }
 0x821   :  { %945 = vrot.lane.b32.xlu1 %v3162_v52, %s3390_s28 }
 0x893   :  { %v946_v53 = vpop.permute.xlu1 %945 }
 0x894   :  { %v948_v55 = vmul.f32 %v946_v53, %v931_v42 }
 0x896   :  { %v949_v56 = vpack.c.bf16 %v948_v55, %v948_v55 }
 0x898   :  { %v1000_v57 = vrot.slane %v949_v56, 1  ;;  %951 = vrot.lane.b32.xlu0 %v949_v56, %s3398_s6 }
 0x89a   :  { %1001 = vrot.lane.b32.xlu1 %v1000_v57, %s3398_s6 }
 0x90a   :  { %v952_v58 = vpop.permute.xlu0 %951 }
 0x90b   :  { %2920 = vmatmul.mubr.msk.bf16.vlgmr.msra.gmra.mrb[16].mxu0 %vm543_vm3, %v952_v58 }
 0x90c   :  { %v1002_v59 = vpop.permute.xlu1 %1001  ;;  %2932 = vmatpush3.bf16.msra.mxu0 %v3554_v28  ;;  %2935 = vmatprep.mubr.msk.bf16.mxu0 %vm3396_vm2, %v3395_v3 }
 0x90d   :  { %2928 = vmatmul.mubr.msk.bf16.vlgmr.msra.gmra.mrb[16].mxu1 %vm543_vm3, %v1002_v59  ;;  %2933 = vmatprep.subr.bf16.mxu0 %v3395_v3 }
 0x90e   :  { %2940 = vmatpush3.bf16.msra.mxu1 %v3562_v32  ;;  %2943 = vmatprep.mubr.msk.bf16.mxu1 %vm3396_vm2, %v3395_v3 }
 0x90f   :  { %2941 = vmatprep.subr.bf16.mxu1 %v3395_v3 }
 0x910   :  { %2934 = vmatpush3.bf16.msra.mxu0 %v3565_v35 }
 0x911   :  { %2947 = vmatprep.subr.bf16.mxu0 %v3395_v3 }
 0x912   :  { %2942 = vmatpush3.bf16.msra.mxu1 %v3575_v36 }
 0x913   :  { %2955 = vmatprep.subr.bf16.mxu1 %v3395_v3 }
 0x9de   :  { %v990_v61 = vpop.f32.mrb[16].mxu0 }
 0x9df   :  { %v997_v62 = vrot.slane %v990_v61, 2  ;;  %v2921_v63 = vpop.f32.mrb[17].mxu0 }
 0x9e0   :  { %v993_v1 = vpop.f32.mrb[18].mxu0  ;;  %v1040_v0 = vpop.f32.mrb[16].mxu1 }
 0x9e1   :  { %v999_v4 = vadd.f32 %v997_v62, %v3623_v2  ;;  %v1046_v5 = vadd.f32 %v1040_v0, %v3617_v60  ;;  %v2922_v6 = vpop.f32.mrb[19].mxu0  ;;  %v2929_v9 = vpop.f32.mrb[17].mxu1 }
 0x9e2   :  { %v1043_v10 = vpop.f32.mrb[18].mxu1 }
 0x9e3   :  { %v1048_v11 = vrot.slane %v999_v4, 6  ;;  %v1051_v12 = vrot.slane %v1046_v5, 6  ;;  %v2930_v13 = vpop.f32.mrb[19].mxu1 }
 0x9e5   :  { %v1053_v14 = vsel %vm652_vm7, %v1048_v11, %v1051_v12 }
 0x9e6   :  { %v1054_v15 = vmul.f32 %v1053_v14, %v3629_v7 }
 0x9e8   :  { %v2716_v17 = vmul.f32 -1.442695, %v1054_v15 }
 0x9ea   :  { %3163 = vpow2.f32 %v2716_v17 }
 0x9f4   :  { %v3164_v18 = vpop.eup %3163 }
 0x9f5   :  { %v1058_v19 = vadd.f32 1.0, %v3164_v18 }
 0x9f7   :  { %3165 = vrcp.f32 %v1058_v19 }
 0xa01   :  { %v3166_v20 = vpop.eup %3165 }
 0xa02   :  { %v1061_v2 = vmul.f32 %v3166_v20, %v3629_v7 }
 0xa04   :  { %v1062_v60 = vadd.f32 %v1061_v2, %v3636_v16 }
 0xa06   :  { %1065 = vrot.lane.b32.xlu0 %v1062_v60, %s3390_s28  ;;  %v1063_v23 = vmul.f32 %v1062_v60, %v942_v51 }
 0xa78   :  { %v1066_v21 = vpop.permute.xlu0 %1065 }
 0xa79   :  { %v1068_v22 = vmul.f32 %v1066_v21, %v1062_v60 }
 0xa7b   :  { %1070 = vrot.lane.b32.xlu1 %v1068_v22, %s3398_s6 }
 0xaed   :  { %v1071_v24 = vpop.permute.xlu1 %1070 }
 0xaee   :  { %v1073_v25 = vadd.f32 %v1071_v24, %v1063_v23 }
 0xaf0   :  { %3167 = vtanh.f32 %v1073_v25 }
 0xafa   :  { %v3168_v26 = vpop.eup %3167 }
 0xafb   :  { %1076 = vrot.lane.b32.xlu0 %v3168_v26, %s3390_s28 }
 0xb6d   :  { %v1077_v27 = vpop.permute.xlu0 %1076 }
 0xb6e   :  { %v1079_v29 = vmul.f32 %v1077_v27, %v1062_v60 }
 0xb70   :  { %v1080_v30 = vpack.c.bf16 %v1079_v29, %v1079_v29 }
 0xb72   :  { %v1128_v31 = vrot.slane %v1080_v30, 1  ;;  %1082 = vrot.lane.b32.xlu0 %v1080_v30, %s3398_s6 }
 0xb74   :  { %1129 = vrot.lane.b32.xlu1 %v1128_v31, %s3398_s6 }
 0xbe4   :  { %v1083_v33 = vpop.permute.xlu0 %1082 }
 0xbe5   :  { %2936 = vmatmul.mubr.msk.bf16.vlgmr.msra.gmra.mrb[20].mxu0 %vm543_vm3, %v1083_v33 }
 0xbe6   :  { %v1130_v34 = vpop.permute.xlu1 %1129  ;;  %2948 = vmatpush3.bf16.msra.mxu0 %v3554_v28  ;;  %2951 = vmatprep.mubr.msk.bf16.mxu0 %vm3396_vm2, %v3395_v3 }
 0xbe7   :  { %2944 = vmatmul.mubr.msk.bf16.vlgmr.msra.gmra.mrb[20].mxu1 %vm543_vm3, %v1130_v34  ;;  %2949 = vmatprep.subr.bf16.mxu0 %v3395_v3 }
 0xbe8   :  { %2956 = vmatpush3.bf16.msra.mxu1 %v3562_v32  ;;  %2959 = vmatprep.mubr.msk.bf16.mxu1 %vm3396_vm2, %v3395_v3 }
 0xbe9   :  { %2957 = vmatprep.subr.bf16.mxu1 %v3395_v3 }
 0xbea   :  { %2950 = vmatpush3.bf16.msra.mxu0 %v3565_v35 }
 0xbeb   :  { %2963 = vmatprep.subr.bf16.mxu0 %v3395_v3 }
 0xbec   :  { %2958 = vmatpush3.bf16.msra.mxu1 %v3575_v36 }
 0xbed   :  { %2971 = vmatprep.subr.bf16.mxu1 %v3395_v3 }
 0xcb8   :  { %v1121_v8 = vpop.f32.mrb[20].mxu0 }
 0xcb9   :  { %v2937_v37 = vpop.f32.mrb[21].mxu0  ;;  %v1127_v51 = vadd.f32 %v1121_v8, %v3610_v49 }
 0xcba   :  { %v1124_v38 = vpop.f32.mrb[22].mxu0  ;;  %v1168_v39 = vpop.f32.mrb[20].mxu1 }
 0xcbb   :  { %v1175_v40 = vrot.slane %v1168_v39, 2  ;;  %v2938_v42 = vpop.f32.mrb[23].mxu0  ;;  %v2945_v43 = vpop.f32.mrb[21].mxu1 }
 0xcbc   :  { %v1171_v44 = vpop.f32.mrb[22].mxu1 }
 0xcbd   :  { %v1177_v46 = vadd.f32 %v1175_v40, %v3608_v47  ;;  %v2946_v48 = vpop.f32.mrb[23].mxu1 }
 0xcbf   :  { %v1179_v52 = vrot.slane %v1177_v46, 4 }
 0xcc1   :  { %v1181_v53 = vsel %vm652_vm7, %v1127_v51, %v1179_v52 }
 0xcc2   :  { %v1182_v55 = vmul.f32 %v1181_v53, %v3629_v7 }
 0xcc4   :  { %v2719_v56 = vmul.f32 -1.442695, %v1182_v55 }
 0xcc6   :  { %3169 = vpow2.f32 %v2719_v56 }
 0xcd0   :  { %v3170_v57 = vpop.eup %3169 }
 0xcd1   :  { %v1186_v58 = vadd.f32 1.0, %v3170_v57 }
 0xcd3   :  { %3171 = vrcp.f32 %v1186_v58 }
 0xcdd   :  { %v3172_v59 = vpop.eup %3171 }
 0xcde   :  { %v1189_v61 = vmul.f32 %v3172_v59, %v3629_v7 }
 0xce0   :  { %v1190_v62 = vadd.f32 %v1189_v61, %v3636_v16 }
 0xce2   :  { %1193 = vrot.lane.b32.xlu1 %v1190_v62, %s3390_s28  ;;  %v1191_v0 = vmul.f32 %v1190_v62, %v1073_v25 }
 0xd54   :  { %v1194_v63 = vpop.permute.xlu1 %1193 }
 0xd55   :  { %v1196_v1 = vmul.f32 %v1194_v63, %v1190_v62 }
 0xd57   :  { %1198 = vrot.lane.b32.xlu0 %v1196_v1, %s3398_s6 }
 0xdc9   :  { %v1199_v4 = vpop.permute.xlu0 %1198 }
 0xdca   :  { %v1201_v5 = vadd.f32 %v1199_v4, %v1191_v0 }
 0xdcc   :  { %3173 = vtanh.f32 %v1201_v5 }
 0xdd6   :  { %v3174_v6 = vpop.eup %3173 }
 0xdd7   :  { %1204 = vrot.lane.b32.xlu1 %v3174_v6, %s3390_s28 }
 0xe49   :  { %v1205_v9 = vpop.permute.xlu1 %1204 }
 0xe4a   :  { %v1207_v10 = vmul.f32 %v1205_v9, %v1190_v62 }
 0xe4c   :  { %v1208_v11 = vpack.c.bf16 %v1207_v10, %v1207_v10 }
 0xe4e   :  { %v1259_v12 = vrot.slane %v1208_v11, 1  ;;  %1210 = vrot.lane.b32.xlu0 %v1208_v11, %s3398_s6 }
 0xe50   :  { %1260 = vrot.lane.b32.xlu1 %v1259_v12, %s3398_s6 }
 0xec0   :  { %v1211_v13 = vpop.permute.xlu0 %1210 }
 0xec1   :  { %2952 = vmatmul.mubr.msk.bf16.vlgmr.msra.gmra.mrb[24].mxu0 %vm543_vm3, %v1211_v13 }
 0xec2   :  { %v1261_v14 = vpop.permute.xlu1 %1260  ;;  %2964 = vmatpush3.bf16.msra.mxu0 %v3554_v28  ;;  %2967 = vmatprep.mubr.msk.bf16.mxu0 %vm3396_vm2, %v3395_v3 }
 0xec3   :  { %2960 = vmatmul.mubr.msk.bf16.vlgmr.msra.gmra.mrb[24].mxu1 %vm543_vm3, %v1261_v14  ;;  %2965 = vmatprep.subr.bf16.mxu0 %v3395_v3 }
 0xec4   :  { %2972 = vmatpush3.bf16.msra.mxu1 %v3562_v32  ;;  %2975 = vmatprep.mubr.msk.bf16.mxu1 %vm3396_vm2, %v3395_v3 }
 0xec5   :  { %2973 = vmatprep.subr.bf16.mxu1 %v3395_v3 }
 0xec6   :  { %2966 = vmatpush3.bf16.msra.mxu0 %v3565_v35 }
 0xec7   :  { %2979 = vmatprep.subr.bf16.mxu0 %v3395_v3 }
 0xec8   :  { %2974 = vmatpush3.bf16.msra.mxu1 %v3575_v36 }
 0xec9   :  { %2987 = vmatprep.subr.bf16.mxu1 %v3395_v3 }
 0xf94   :  { %v1249_v15 = vpop.f32.mrb[24].mxu0 }
 0xf95   :  { %v1256_v17 = vrot.slane %v1249_v15, 6  ;;  %v2953_v18 = vpop.f32.mrb[25].mxu0 }
 0xf96   :  { %v1252_v19 = vpop.f32.mrb[26].mxu0  ;;  %v1299_v20 = vpop.f32.mrb[24].mxu1 }
 0xf97   :  { %v1258_v2 = vadd.f32 %v1256_v17, %v3610_v49  ;;  %v1306_v60 = vrot.slane %v1299_v20, 4  ;;  %v2954_v21 = vpop.f32.mrb[27].mxu0  ;;  %v2961_v22 = vpop.f32.mrb[25].mxu1 }
 0xf98   :  { %v1302_v23 = vpop.f32.mrb[26].mxu1 }
 0xf99   :  { %v1308_v24 = vadd.f32 %v1306_v60, %v3608_v47  ;;  %v2962_v25 = vpop.f32.mrb[27].mxu1  ;;  %v1310_v26 = vrot.slane %v1258_v2, 2 }
 0xf9b   :  { %v1313_v27 = vrot.slane %v1308_v24, 2 }
 0xf9d   :  { %v1315_v29 = vsel %vm652_vm7, %v1310_v26, %v1313_v27 }
 0xf9e   :  { %v1316_v30 = vmul.f32 %v1315_v29, %v3629_v7 }
 0xfa0   :  { %v2722_v31 = vmul.f32 -1.442695, %v1316_v30 }
 0xfa2   :  { %3175 = vpow2.f32 %v2722_v31 }
 0xfac   :  { %v3176_v33 = vpop.eup %3175 }
 0xfad   :  { %v1320_v34 = vadd.f32 1.0, %v3176_v33 }
 0xfaf   :  { %3177 = vrcp.f32 %v1320_v34 }
 0xfb9   :  { %v3178_v8 = vpop.eup %3177 }
 0xfba   :  { %v1323_v37 = vmul.f32 %v3178_v8, %v3629_v7 }
 0xfbc   :  { %v1324_v38 = vadd.f32 %v1323_v37, %v3636_v16 }
 0xfbe   :  { %1327 = vrot.lane.b32.xlu0 %v1324_v38, %s3390_s28  ;;  %v1325_v42 = vmul.f32 %v1324_v38, %v1201_v5 }
0x1030   :  { %v1328_v39 = vpop.permute.xlu0 %1327 }
0x1031   :  { %v1330_v40 = vmul.f32 %v1328_v39, %v1324_v38 }
0x1033   :  { %1332 = vrot.lane.b32.xlu1 %v1330_v40, %s3398_s6 }
0x10a5   :  { %v1333_v43 = vpop.permute.xlu1 %1332 }
0x10a6   :  { %v1335_v44 = vadd.f32 %v1333_v43, %v1325_v42 }
0x10a8   :  { %3179 = vtanh.f32 %v1335_v44 }
0x10b2   :  { %v3180_v46 = vpop.eup %3179 }
0x10b3   :  { %1338 = vrot.lane.b32.xlu0 %v3180_v46, %s3390_s28 }
0x1125   :  { %v1339_v48 = vpop.permute.xlu0 %1338 }
0x1126   :  { %v1341_v51 = vmul.f32 %v1339_v48, %v1324_v38 }
0x1128   :  { %v1342_v52 = vpack.c.bf16 %v1341_v51, %v1341_v51 }
0x112a   :  { %v1393_v53 = vrot.slane %v1342_v52, 1  ;;  %1344 = vrot.lane.b32.xlu1 %v1342_v52, %s3398_s6 }
0x112c   :  { %1394 = vrot.lane.b32.xlu0 %v1393_v53, %s3398_s6 }
0x119c   :  { %v1345_v55 = vpop.permute.xlu1 %1344 }
0x119d   :  { %2968 = vmatmul.mubr.msk.bf16.vlgmr.msra.gmra.mrb[28].mxu0 %vm543_vm3, %v1345_v55 }
0x119e   :  { %v1395_v56 = vpop.permute.xlu0 %1394  ;;  %2980 = vmatpush3.bf16.msra.mxu0 %v3554_v28  ;;  %2983 = vmatprep.mubr.msk.bf16.mxu0 %vm3396_vm2, %v3395_v3 }
0x119f   :  { %2976 = vmatmul.mubr.msk.bf16.vlgmr.msra.gmra.mrb[28].mxu1 %vm543_vm3, %v1395_v56  ;;  %2981 = vmatprep.subr.bf16.mxu0 %v3395_v3 }
0x11a0   :  { %2988 = vmatpush3.bf16.msra.mxu1 %v3562_v32  ;;  %2991 = vmatprep.mubr.msk.bf16.mxu1 %vm3396_vm2, %v3395_v3 }
0x11a1   :  { %2989 = vmatprep.subr.bf16.mxu1 %v3395_v3 }
0x11a2   :  { %2982 = vmatpush3.bf16.msra.mxu0 %v3565_v35 }
0x11a3   :  { %2995 = vmatprep.subr.bf16.mxu0 %v3395_v3 }
0x11a4   :  { %2990 = vmatpush3.bf16.msra.mxu1 %v3575_v36 }
0x11a5   :  { %3003 = vmatprep.subr.bf16.mxu1 %v3395_v3 }
0x1270   :  { %v1383_v57 = vpop.f32.mrb[28].mxu0 }
0x1271   :  { %v1390_v58 = vrot.slane %v1383_v57, 4  ;;  %v2969_v59 = vpop.f32.mrb[29].mxu0 }
0x1272   :  { %v1386_v61 = vpop.f32.mrb[30].mxu0  ;;  %v1433_v62 = vpop.f32.mrb[28].mxu1 }
0x1273   :  { %v1392_v63 = vadd.f32 %v1390_v58, %v3610_v49  ;;  %v1440_v1 = vrot.slane %v1433_v62, 6  ;;  %v2970_v0 = vpop.f32.mrb[31].mxu0  ;;  %v2977_v4 = vpop.f32.mrb[29].mxu1 }
0x1274   :  { %v1436_v5 = vpop.f32.mrb[30].mxu1 }
0x1275   :  { %v1444_v6 = vrot.slane %v1392_v63, 4  ;;  %v1442_v9 = vadd.f32 %v1440_v1, %v3608_v47  ;;  %v2978_v10 = vpop.f32.mrb[31].mxu1 }
0x1277   :  { %v1446_v11 = vsel %vm652_vm7, %v1444_v6, %v1442_v9 }
0x1278   :  { %v1447_v12 = vmul.f32 %v1446_v11, %v3629_v7 }
0x127a   :  { %v2725_v13 = vmul.f32 -1.442695, %v1447_v12 }
0x127c   :  { %3181 = vpow2.f32 %v2725_v13 }
0x1286   :  { %v3182_v14 = vpop.eup %3181 }
0x1287   :  { %v1451_v15 = vadd.f32 1.0, %v3182_v14 }
0x1289   :  { %3183 = vrcp.f32 %v1451_v15 }
0x1293   :  { %v3184_v17 = vpop.eup %3183 }
0x1294   :  { %v1454_v18 = vmul.f32 %v3184_v17, %v3629_v7 }
0x1296   :  { %v1455_v19 = vadd.f32 %v1454_v18, %v3636_v16 }
0x1298   :  { %1458 = vrot.lane.b32.xlu1 %v1455_v19, %s3390_s28  ;;  %v1456_v60 = vmul.f32 %v1455_v19, %v1335_v44 }
0x130a   :  { %v1459_v20 = vpop.permute.xlu1 %1458 }
0x130b   :  { %v1461_v2 = vmul.f32 %v1459_v20, %v1455_v19 }
0x130d   :  { %1463 = vrot.lane.b32.xlu0 %v1461_v2, %s3398_s6 }
0x137f   :  { %v1464_v21 = vpop.permute.xlu0 %1463 }
0x1380   :  { %v1466_v22 = vadd.f32 %v1464_v21, %v1456_v60 }
0x1382   :  { %3185 = vtanh.f32 %v1466_v22 }
0x138c   :  { %v3186_v23 = vpop.eup %3185 }
0x138d   :  { %1469 = vrot.lane.b32.xlu1 %v3186_v23, %s3390_s28 }
0x13ff   :  { %v1470_v24 = vpop.permute.xlu1 %1469 }
0x1400   :  { %v1472_v25 = vmul.f32 %v1470_v24, %v1455_v19 }
0x1402   :  { %v1473_v26 = vpack.c.bf16 %v1472_v25, %v1472_v25 }
0x1404   :  { %v1524_v27 = vrot.slane %v1473_v26, 1  ;;  %1475 = vrot.lane.b32.xlu0 %v1473_v26, %s3398_s6 }
0x1406   :  { %1525 = vrot.lane.b32.xlu1 %v1524_v27, %s3398_s6 }
0x1476   :  { %v1476_v29 = vpop.permute.xlu0 %1475 }
0x1477   :  { %2984 = vmatmul.mubr.msk.bf16.vlgmr.msra.gmra.mrb[32].mxu0 %vm543_vm3, %v1476_v29 }
0x1478   :  { %v1526_v30 = vpop.permute.xlu1 %1525  ;;  %2996 = vmatpush3.bf16.msra.mxu0 %v3554_v28  ;;  %2999 = vmatprep.mubr.msk.bf16.mxu0 %vm3396_vm2, %v3395_v3 }
0x1479   :  { %2992 = vmatmul.mubr.msk.bf16.vlgmr.msra.gmra.mrb[32].mxu1 %vm543_vm3, %v1526_v30  ;;  %2997 = vmatprep.subr.bf16.mxu0 %v3395_v3 }
0x147a   :  { %3004 = vmatpush3.bf16.msra.mxu1 %v3562_v32  ;;  %3007 = vmatprep.mubr.msk.bf16.mxu1 %vm3396_vm2, %v3395_v3 }
0x147b   :  { %3005 = vmatprep.subr.bf16.mxu1 %v3395_v3 }
0x147c   :  { %2998 = vmatpush3.bf16.msra.mxu0 %v3565_v35 }
0x147d   :  { %3011 = vmatprep.subr.bf16.mxu0 %v3395_v3 }
0x147e   :  { %3006 = vmatpush3.bf16.msra.mxu1 %v3575_v36 }
0x147f   :  { %3019 = vmatprep.subr.bf16.mxu1 %v3395_v3 }
0x154a   :  { %v1514_v31 = vpop.f32.mrb[32].mxu0 }
0x154b   :  { %v1521_v33 = vrot.slane %v1514_v31, 2  ;;  %v2985_v34 = vpop.f32.mrb[33].mxu0 }
0x154c   :  { %v1517_v8 = vpop.f32.mrb[34].mxu0  ;;  %v1564_v37 = vpop.f32.mrb[32].mxu1 }
0x154d   :  { %v1523_v38 = vadd.f32 %v1521_v33, %v3610_v49  ;;  %v1570_v39 = vadd.f32 %v1564_v37, %v3608_v47  ;;  %v2986_v40 = vpop.f32.mrb[35].mxu0  ;;  %v2993_v42 = vpop.f32.mrb[33].mxu1 }
0x154e   :  { %v1567_v43 = vpop.f32.mrb[34].mxu1  ;;  %v3847_v42 = vld [vmem:[#allocation12] sm:$0xff]  }
0x154f   :  { %v1572_v44 = vrot.slane %v1523_v38, 6  ;;  %v1575_v46 = vrot.slane %v1570_v39, 6  ;;  %v2994_v48 = vpop.f32.mrb[35].mxu1  ;;  %v3857_v43 = vld [vmem:[%s4041_s5] sm:$0xff]  }
0x1551   :  { %v1577_v51 = vsel %vm652_vm7, %v1572_v44, %v1575_v46  ;;  %v3863_v44 = vld [vmem:[#allocation12 + $0x8] sm:$0xff]   ;;  %v3870_v46 = vld [vmem:[%s4041_s5 + $0x8] sm:$0xff]   ;;  %s3399_s5 = smov 96  }
0x1552   :  { %v1578_v52 = vmul.f32 %v1577_v51, %v3629_v7 }
0x1554   :  { %v2728_v53 = vmul.f32 -1.442695, %v1578_v52 }
0x1556   :  { %3187 = vpow2.f32 %v2728_v53 }
0x1560   :  { %v3188_v55 = vpop.eup %3187 }
0x1561   :  { %v1582_v56 = vadd.f32 1.0, %v3188_v55 }
0x1563   :  { %3189 = vrcp.f32 %v1582_v56 }
0x156d   :  { %v3190_v57 = vpop.eup %3189 }
0x156e   :  { %v1585_v49 = vmul.f32 %v3190_v57, %v3629_v7 }
0x1570   :  { %v1586_v47 = vadd.f32 %v1585_v49, %v3636_v16 }
0x1572   :  { %1589 = vrot.lane.b32.xlu0 %v1586_v47, %s3390_s28  ;;  %v1587_v61 = vmul.f32 %v1586_v47, %v1466_v22 }
0x15e4   :  { %v1590_v58 = vpop.permute.xlu0 %1589 }
0x15e5   :  { %v1592_v59 = vmul.f32 %v1590_v58, %v1586_v47 }
0x15e7   :  { %1594 = vrot.lane.b32.xlu1 %v1592_v59, %s3398_s6 }
0x1659   :  { %v1595_v62 = vpop.permute.xlu1 %1594 }
0x165a   :  { %v1597_v63 = vadd.f32 %v1595_v62, %v1587_v61 }
0x165c   :  { %3191 = vtanh.f32 %v1597_v63 }
0x1666   :  { %v3192_v1 = vpop.eup %3191 }
0x1667   :  { %1600 = vrot.lane.b32.xlu0 %v3192_v1, %s3390_s28 }
0x16d9   :  { %v1601_v0 = vpop.permute.xlu0 %1600 }
0x16da   :  { %v1603_v4 = vmul.f32 %v1601_v0, %v1586_v47 }
0x16dc   :  { %v1604_v5 = vpack.c.bf16 %v1603_v4, %v1603_v4 }
0x16de   :  { %v1652_v6 = vrot.slane %v1604_v5, 1  ;;  %1606 = vrot.lane.b32.xlu0 %v1604_v5, %s3398_s6 }
0x16e0   :  { %1653 = vrot.lane.b32.xlu1 %v1652_v6, %s3398_s6 }
0x1750   :  { %v1607_v9 = vpop.permute.xlu0 %1606 }
0x1751   :  { %3000 = vmatmul.mubr.msk.bf16.vlgmr.msra.gmra.mrb[36].mxu0 %vm543_vm3, %v1607_v9 }
0x1752   :  { %v1654_v10 = vpop.permute.xlu1 %1653  ;;  %3012 = vmatpush3.bf16.msra.mxu0 %v3554_v28  ;;  %3015 = vmatprep.mubr.msk.bf16.mxu0 %vm3396_vm2, %v3395_v3 }
0x1753   :  { %3008 = vmatmul.mubr.msk.bf16.vlgmr.msra.gmra.mrb[36].mxu1 %vm543_vm3, %v1654_v10  ;;  %3013 = vmatprep.subr.bf16.mxu0 %v3395_v3 }
0x1754   :  { %3020 = vmatpush3.bf16.msra.mxu1 %v3562_v32  ;;  %3023 = vmatprep.mubr.msk.bf16.mxu1 %vm3396_vm2, %v3395_v3 }
0x1755   :  { %3021 = vmatprep.subr.bf16.mxu1 %v3395_v3 }
0x1756   :  { %3014 = vmatpush3.bf16.msra.mxu0 %v3565_v35 }
0x1757   :  { %3027 = vmatprep.subr.bf16.mxu0 %v3395_v3 }
0x1758   :  { %3022 = vmatpush3.bf16.msra.mxu1 %v3575_v36 }
0x1759   :  { %3035 = vmatprep.subr.bf16.mxu1 %v3395_v3 }
0x1824   :  { %v1645_v28 = vpop.f32.mrb[36].mxu0 }
0x1825   :  { %v3001_v11 = vpop.f32.mrb[37].mxu0  ;;  %v1651_v20 = vadd.f32 %v1645_v28, %v3604_v41 }
0x1826   :  { %v1648_v12 = vpop.f32.mrb[38].mxu0  ;;  %v1692_v13 = vpop.f32.mrb[36].mxu1 }
0x1827   :  { %v1699_v14 = vrot.slane %v1692_v13, 2  ;;  %v3002_v15 = vpop.f32.mrb[39].mxu0  ;;  %v3009_v32 = vpop.f32.mrb[37].mxu1 }
0x1828   :  { %v1695_v17 = vpop.f32.mrb[38].mxu1 }
0x1829   :  { %v1701_v18 = vadd.f32 %v1699_v14, %v3615_v54  ;;  %v3010_v19 = vpop.f32.mrb[39].mxu1 }
0x182b   :  { %v1703_v35 = vrot.slane %v1701_v18, 4 }
0x182d   :  { %v1705_v2 = vsel %vm652_vm7, %v1651_v20, %v1703_v35 }
0x182e   :  { %v1706_v36 = vmul.f32 %v1705_v2, %v3629_v7 }
0x1830   :  { %v2731_v60 = vmul.f32 -1.442695, %v1706_v36 }
0x1832   :  { %3193 = vpow2.f32 %v2731_v60 }
0x183c   :  { %v3194_v21 = vpop.eup %3193 }
0x183d   :  { %v1710_v22 = vadd.f32 1.0, %v3194_v21 }
0x183f   :  { %3195 = vrcp.f32 %v1710_v22 }
0x1849   :  { %v3196_v23 = vpop.eup %3195 }
0x184a   :  { %v1713_v24 = vmul.f32 %v3196_v23, %v3629_v7 }
0x184c   :  { %v1714_v25 = vadd.f32 %v1713_v24, %v3636_v16 }
0x184e   :  { %1717 = vrot.lane.b32.xlu1 %v1714_v25, %s3390_s28  ;;  %v1715_v29 = vmul.f32 %v1714_v25, %v1597_v63 }
0x18c0   :  { %v1718_v26 = vpop.permute.xlu1 %1717 }
0x18c1   :  { %v1720_v27 = vmul.f32 %v1718_v26, %v1714_v25 }
0x18c3   :  { %1722 = vrot.lane.b32.xlu0 %v1720_v27, %s3398_s6 }
0x1935   :  { %v1723_v30 = vpop.permute.xlu0 %1722 }
0x1936   :  { %v1725_v31 = vadd.f32 %v1723_v30, %v1715_v29 }
0x1938   :  { %3197 = vtanh.f32 %v1725_v31 }
0x1942   :  { %v3198_v33 = vpop.eup %3197 }
0x1943   :  { %1728 = vrot.lane.b32.xlu1 %v3198_v33, %s3390_s28 }
0x19b5   :  { %v1729_v34 = vpop.permute.xlu1 %1728 }
0x19b6   :  { %v1731_v8 = vmul.f32 %v1729_v34, %v1714_v25 }
0x19b8   :  { %v1732_v37 = vpack.c.bf16 %v1731_v8, %v1731_v8 }
0x19ba   :  { %v1783_v38 = vrot.slane %v1732_v37, 1  ;;  %1734 = vrot.lane.b32.xlu0 %v1732_v37, %s3398_s6 }
0x19bc   :  { %1784 = vrot.lane.b32.xlu1 %v1783_v38, %s3398_s6 }
0x1a2c   :  { %v1735_v39 = vpop.permute.xlu0 %1734 }
0x1a2d   :  { %3016 = vmatmul.mubr.msk.bf16.vlgmr.msra.gmra.mrb[40].mxu0 %vm543_vm3, %v1735_v39 }
0x1a2e   :  { %v1785_v40 = vpop.permute.xlu1 %1784  ;;  %3028 = vmatpush3.bf16.msra.mxu0 %v3847_v42  ;;  %3031 = vmatprep.mubr.msk.bf16.mxu0 %vm3396_vm2, %v3395_v3 }
0x1a2f   :  { %3024 = vmatmul.mubr.msk.bf16.vlgmr.msra.gmra.mrb[40].mxu1 %vm543_vm3, %v1785_v40  ;;  %3029 = vmatprep.subr.bf16.mxu0 %v3395_v3 }
0x1a30   :  { %3036 = vmatpush3.bf16.msra.mxu1 %v3857_v43  ;;  %3039 = vmatprep.mubr.msk.bf16.mxu1 %vm3396_vm2, %v3395_v3 }
0x1a31   :  { %3037 = vmatprep.subr.bf16.mxu1 %v3395_v3 }
0x1a32   :  { %3030 = vmatpush3.bf16.msra.mxu0 %v3863_v44 }
0x1a33   :  { %3043 = vmatprep.subr.bf16.mxu0 %v3395_v3 }
0x1a34   :  { %3038 = vmatpush3.bf16.msra.mxu1 %v3870_v46 }
0x1a35   :  { %3051 = vmatprep.subr.bf16.mxu1 %v3395_v3 }
0x1b00   :  { %v1773_v48 = vpop.f32.mrb[40].mxu0 }
0x1b01   :  { %v1780_v51 = vrot.slane %v1773_v48, 6  ;;  %v3017_v52 = vpop.f32.mrb[41].mxu0 }
0x1b02   :  { %v1776_v53 = vpop.f32.mrb[42].mxu0  ;;  %v1823_v55 = vpop.f32.mrb[40].mxu1 }
0x1b03   :  { %v1782_v56 = vadd.f32 %v1780_v51, %v3604_v41  ;;  %v1830_v57 = vrot.slane %v1823_v55, 4  ;;  %v3018_v49 = vpop.f32.mrb[43].mxu0  ;;  %v3025_v47 = vpop.f32.mrb[41].mxu1 }
0x1b04   :  { %v1826_v58 = vpop.f32.mrb[42].mxu1 }
0x1b05   :  { %v1832_v59 = vadd.f32 %v1830_v57, %v3615_v54  ;;  %v3026_v61 = vpop.f32.mrb[43].mxu1  ;;  %v1834_v62 = vrot.slane %v1782_v56, 2 }
0x1b07   :  { %v1837_v63 = vrot.slane %v1832_v59, 2 }
0x1b09   :  { %v1839_v1 = vsel %vm652_vm7, %v1834_v62, %v1837_v63 }
0x1b0a   :  { %v1840_v0 = vmul.f32 %v1839_v1, %v3629_v7 }
0x1b0c   :  { %v2734_v4 = vmul.f32 -1.442695, %v1840_v0 }
0x1b0e   :  { %3199 = vpow2.f32 %v2734_v4 }
0x1b18   :  { %v3200_v5 = vpop.eup %3199 }
0x1b19   :  { %v1844_v6 = vadd.f32 1.0, %v3200_v5 }
0x1b1b   :  { %3201 = vrcp.f32 %v1844_v6 }
0x1b25   :  { %v3202_v9 = vpop.eup %3201 }
0x1b26   :  { %v1847_v10 = vmul.f32 %v3202_v9, %v3629_v7 }
0x1b28   :  { %v1848_v28 = vadd.f32 %v1847_v10, %v3636_v16 }
0x1b2a   :  { %1851 = vrot.lane.b32.xlu0 %v1848_v28, %s3390_s28  ;;  %v1849_v13 = vmul.f32 %v1848_v28, %v1725_v31 }
0x1b9c   :  { %v1852_v11 = vpop.permute.xlu0 %1851 }
0x1b9d   :  { %v1854_v12 = vmul.f32 %v1852_v11, %v1848_v28 }
0x1b9f   :  { %1856 = vrot.lane.b32.xlu1 %v1854_v12, %s3398_s6 }
0x1c11   :  { %v1857_v14 = vpop.permute.xlu1 %1856 }
0x1c12   :  { %v1859_v15 = vadd.f32 %v1857_v14, %v1849_v13 }
0x1c14   :  { %3203 = vtanh.f32 %v1859_v15 }
0x1c1e   :  { %v3204_v32 = vpop.eup %3203 }
0x1c1f   :  { %1862 = vrot.lane.b32.xlu0 %v3204_v32, %s3390_s28 }
0x1c91   :  { %v1863_v17 = vpop.permute.xlu0 %1862 }
0x1c92   :  { %v1865_v18 = vmul.f32 %v1863_v17, %v1848_v28 }
0x1c94   :  { %v1866_v19 = vpack.c.bf16 %v1865_v18, %v1865_v18 }
0x1c96   :  { %v1917_v20 = vrot.slane %v1866_v19, 1  ;;  %1868 = vrot.lane.b32.xlu1 %v1866_v19, %s3398_s6 }
0x1c98   :  { %1918 = vrot.lane.b32.xlu0 %v1917_v20, %s3398_s6 }
0x1d08   :  { %v1869_v35 = vpop.permute.xlu1 %1868 }
0x1d09   :  { %3032 = vmatmul.mubr.msk.bf16.vlgmr.msra.gmra.mrb[44].mxu0 %vm543_vm3, %v1869_v35 }
0x1d0a   :  { %v1919_v2 = vpop.permute.xlu0 %1918  ;;  %3044 = vmatpush3.bf16.msra.mxu0 %v3847_v42  ;;  %3047 = vmatprep.mubr.msk.bf16.mxu0 %vm3396_vm2, %v3395_v3 }
0x1d0b   :  { %3040 = vmatmul.mubr.msk.bf16.vlgmr.msra.gmra.mrb[44].mxu1 %vm543_vm3, %v1919_v2  ;;  %3045 = vmatprep.subr.bf16.mxu0 %v3395_v3 }
0x1d0c   :  { %3052 = vmatpush3.bf16.msra.mxu1 %v3857_v43  ;;  %3055 = vmatprep.mubr.msk.bf16.mxu1 %vm3396_vm2, %v3395_v3 }
0x1d0d   :  { %3053 = vmatprep.subr.bf16.mxu1 %v3395_v3 }
0x1d0e   :  { %3046 = vmatpush3.bf16.msra.mxu0 %v3863_v44 }
0x1d0f   :  { %3059 = vmatprep.subr.bf16.mxu0 %v3395_v3 }
0x1d10   :  { %3054 = vmatpush3.bf16.msra.mxu1 %v3870_v46 }
0x1d11   :  { %3067 = vmatprep.subr.bf16.mxu1 %v3395_v3 }
0x1ddc   :  { %v1907_v36 = vpop.f32.mrb[44].mxu0 }
0x1ddd   :  { %v1914_v60 = vrot.slane %v1907_v36, 4  ;;  %v3033_v21 = vpop.f32.mrb[45].mxu0 }
0x1dde   :  { %v1910_v22 = vpop.f32.mrb[46].mxu0  ;;  %v1957_v23 = vpop.f32.mrb[44].mxu1 }
0x1ddf   :  { %v1916_v24 = vadd.f32 %v1914_v60, %v3604_v41  ;;  %v1964_v25 = vrot.slane %v1957_v23, 6  ;;  %v3034_v26 = vpop.f32.mrb[47].mxu0  ;;  %v3041_v27 = vpop.f32.mrb[45].mxu1 }
0x1de0   :  { %v1960_v29 = vpop.f32.mrb[46].mxu1 }
0x1de1   :  { %v1968_v30 = vrot.slane %v1916_v24, 4  ;;  %v1966_v31 = vadd.f32 %v1964_v25, %v3615_v54  ;;  %v3042_v33 = vpop.f32.mrb[47].mxu1 }
0x1de3   :  { %v1970_v34 = vsel %vm652_vm7, %v1968_v30, %v1966_v31 }
0x1de4   :  { %v1971_v8 = vmul.f32 %v1970_v34, %v3629_v7 }
0x1de6   :  { %v2737_v37 = vmul.f32 -1.442695, %v1971_v8 }
0x1de8   :  { %3205 = vpow2.f32 %v2737_v37 }
0x1df2   :  { %v3206_v38 = vpop.eup %3205 }
0x1df3   :  { %v1975_v39 = vadd.f32 1.0, %v3206_v38 }
0x1df5   :  { %3207 = vrcp.f32 %v1975_v39 }
0x1dff   :  { %v3208_v40 = vpop.eup %3207 }
0x1e00   :  { %v1978_v48 = vmul.f32 %v3208_v40, %v3629_v7 }
0x1e02   :  { %v1979_v51 = vadd.f32 %v1978_v48, %v3636_v16 }
0x1e04   :  { %1982 = vrot.lane.b32.xlu1 %v1979_v51, %s3390_s28  ;;  %v1980_v55 = vmul.f32 %v1979_v51, %v1859_v15 }
0x1e76   :  { %v1983_v52 = vpop.permute.xlu1 %1982 }
0x1e77   :  { %v1985_v53 = vmul.f32 %v1983_v52, %v1979_v51 }
0x1e79   :  { %1987 = vrot.lane.b32.xlu0 %v1985_v53, %s3398_s6 }
0x1eeb   :  { %v1988_v56 = vpop.permute.xlu0 %1987 }
0x1eec   :  { %v1990_v57 = vadd.f32 %v1988_v56, %v1980_v55 }
0x1eee   :  { %3209 = vtanh.f32 %v1990_v57 }
0x1ef8   :  { %v3210_v49 = vpop.eup %3209 }
0x1ef9   :  { %1993 = vrot.lane.b32.xlu1 %v3210_v49, %s3390_s28 }
0x1f6b   :  { %v1994_v47 = vpop.permute.xlu1 %1993 }
0x1f6c   :  { %v1996_v58 = vmul.f32 %v1994_v47, %v1979_v51 }
0x1f6e   :  { %v1997_v59 = vpack.c.bf16 %v1996_v58, %v1996_v58 }
0x1f70   :  { %v2048_v61 = vrot.slane %v1997_v59, 1  ;;  %1999 = vrot.lane.b32.xlu0 %v1997_v59, %s3398_s6 }
0x1f72   :  { %2049 = vrot.lane.b32.xlu1 %v2048_v61, %s3398_s6 }
0x1fe2   :  { %v2000_v62 = vpop.permute.xlu0 %1999 }
0x1fe3   :  { %3048 = vmatmul.mubr.msk.bf16.vlgmr.msra.gmra.mrb[48].mxu0 %vm543_vm3, %v2000_v62 }
0x1fe4   :  { %v2050_v63 = vpop.permute.xlu1 %2049  ;;  %3060 = vmatpush3.bf16.msra.mxu0 %v3847_v42  ;;  %3063 = vmatprep.mubr.msk.bf16.mxu0 %vm3396_vm2, %v3395_v3 }
0x1fe5   :  { %3056 = vmatmul.mubr.msk.bf16.vlgmr.msra.gmra.mrb[48].mxu1 %vm543_vm3, %v2050_v63  ;;  %3061 = vmatprep.subr.bf16.mxu0 %v3395_v3 }
0x1fe6   :  { %3068 = vmatpush3.bf16.msra.mxu1 %v3857_v43  ;;  %3071 = vmatprep.mubr.msk.bf16.mxu1 %vm3396_vm2, %v3395_v3 }
0x1fe7   :  { %3069 = vmatprep.subr.bf16.mxu1 %v3395_v3 }
0x1fe8   :  { %3062 = vmatpush3.bf16.msra.mxu0 %v3863_v44 }
0x1fe9   :  { %3075 = vmatprep.subr.bf16.mxu0 %v3395_v3 }
0x1fea   :  { %3070 = vmatpush3.bf16.msra.mxu1 %v3870_v46 }
0x1feb   :  { %3083 = vmatprep.subr.bf16.mxu1 %v3395_v3 }
0x20b6   :  { %v2038_v1 = vpop.f32.mrb[48].mxu0 }
0x20b7   :  { %v2045_v0 = vrot.slane %v2038_v1, 2  ;;  %v3049_v4 = vpop.f32.mrb[49].mxu0 }
0x20b8   :  { %v2041_v5 = vpop.f32.mrb[50].mxu0  ;;  %v2088_v6 = vpop.f32.mrb[48].mxu1 }
0x20b9   :  { %v2047_v9 = vadd.f32 %v2045_v0, %v3604_v41  ;;  %v2094_v10 = vadd.f32 %v2088_v6, %v3615_v54  ;;  %v3050_v28 = vpop.f32.mrb[51].mxu0  ;;  %v3057_v11 = vpop.f32.mrb[49].mxu1 }
0x20ba   :  { %v2091_v12 = vpop.f32.mrb[50].mxu1 }
0x20bb   :  { %v2096_v13 = vrot.slane %v2047_v9, 6  ;;  %v2099_v14 = vrot.slane %v2094_v10, 6  ;;  %v3058_v15 = vpop.f32.mrb[51].mxu1 }
0x20bd   :  { %v2101_v32 = vsel %vm652_vm7, %v2096_v13, %v2099_v14 }
0x20be   :  { %v2102_v17 = vmul.f32 %v2101_v32, %v3629_v7 }
0x20c0   :  { %v2740_v18 = vmul.f32 -1.442695, %v2102_v17 }
0x20c2   :  { %3211 = vpow2.f32 %v2740_v18 }
0x20cc   :  { %v3212_v19 = vpop.eup %3211 }
0x20cd   :  { %v2106_v20 = vadd.f32 1.0, %v3212_v19 }
0x20cf   :  { %3213 = vrcp.f32 %v2106_v20 }
0x20d9   :  { %v3214_v35 = vpop.eup %3213 }
0x20da   :  { %v2109_v41 = vmul.f32 %v3214_v35, %v3629_v7 }
0x20dc   :  { %v2110_v54 = vadd.f32 %v2109_v41, %v3636_v16 }
0x20de   :  { %2113 = vrot.lane.b32.xlu0 %v2110_v54, %s3390_s28  ;;  %v2111_v60 = vmul.f32 %v2110_v54, %v1990_v57 }
0x2150   :  { %v2114_v2 = vpop.permute.xlu0 %2113 }
0x2151   :  { %v2116_v36 = vmul.f32 %v2114_v2, %v2110_v54 }
0x2153   :  { %2118 = vrot.lane.b32.xlu1 %v2116_v36, %s3398_s6 }
0x21c5   :  { %v2119_v21 = vpop.permute.xlu1 %2118 }
0x21c6   :  { %v2121_v22 = vadd.f32 %v2119_v21, %v2111_v60 }
0x21c8   :  { %3215 = vtanh.f32 %v2121_v22 }
0x21d2   :  { %v3216_v23 = vpop.eup %3215 }
0x21d3   :  { %2124 = vrot.lane.b32.xlu0 %v3216_v23, %s3390_s28 }
0x2245   :  { %v2125_v24 = vpop.permute.xlu0 %2124 }
0x2246   :  { %v2127_v25 = vmul.f32 %v2125_v24, %v2110_v54 }
0x2248   :  { %v2128_v26 = vpack.c.bf16 %v2127_v25, %v2127_v25 }
0x224a   :  { %v2176_v27 = vrot.slane %v2128_v26, 1  ;;  %2130 = vrot.lane.b32.xlu0 %v2128_v26, %s3398_s6 }
0x224c   :  { %2177 = vrot.lane.b32.xlu1 %v2176_v27, %s3398_s6 }
0x22bc   :  { %v2131_v29 = vpop.permute.xlu0 %2130 }
0x22bd   :  { %3064 = vmatmul.mubr.msk.bf16.vlgmr.msra.gmra.mrb[52].mxu0 %vm543_vm3, %v2131_v29 }
0x22be   :  { %v2178_v30 = vpop.permute.xlu1 %2177  ;;  %3076 = vmatpush3.bf16.msra.mxu0 %v3847_v42  ;;  %3079 = vmatprep.mubr.msk.bf16.mxu0 %vm3396_vm2, %v3395_v3 }
0x22bf   :  { %3072 = vmatmul.mubr.msk.bf16.vlgmr.msra.gmra.mrb[52].mxu1 %vm543_vm3, %v2178_v30  ;;  %3077 = vmatprep.subr.bf16.mxu0 %v3395_v3 }
0x22c0   :  { %3084 = vmatpush3.bf16.msra.mxu1 %v3857_v43  ;;  %3087 = vmatprep.mubr.msk.bf16.mxu1 %vm3396_vm2, %v3395_v3 }
0x22c1   :  { %3085 = vmatprep.subr.bf16.mxu1 %v3395_v3 }
0x22c2   :  { %3078 = vmatpush3.bf16.msra.mxu0 %v3863_v44 }
0x22c3   :  { %3091 = vmatprep.subr.bf16.mxu0 %v3395_v3 }
0x22c4   :  { %3086 = vmatpush3.bf16.msra.mxu1 %v3870_v46 }
0x22c5   :  { %3099 = vmatprep.subr.bf16.mxu1 %v3395_v3 }
0x2390   :  { %v2169_v31 = vpop.f32.mrb[52].mxu0 }
0x2391   :  { %v3065_v33 = vpop.f32.mrb[53].mxu0  ;;  %v2175_v52 = vadd.f32 %v2169_v31, %v3606_v45 }
0x2392   :  { %v2172_v34 = vpop.f32.mrb[54].mxu0  ;;  %v2216_v8 = vpop.f32.mrb[52].mxu1 }
0x2393   :  { %v2223_v37 = vrot.slane %v2216_v8, 2  ;;  %v3066_v38 = vpop.f32.mrb[55].mxu0  ;;  %v3073_v39 = vpop.f32.mrb[53].mxu1 }
0x2394   :  { %v2219_v40 = vpop.f32.mrb[54].mxu1 }
0x2395   :  { %v2225_v48 = vadd.f32 %v2223_v37, %v3612_v50  ;;  %v3074_v51 = vpop.f32.mrb[55].mxu1 }
0x2397   :  { %v2227_v53 = vrot.slane %v2225_v48, 4 }
0x2399   :  { %v2229_v55 = vsel %vm652_vm7, %v2175_v52, %v2227_v53 }
0x239a   :  { %v2230_v56 = vmul.f32 %v2229_v55, %v3629_v7 }
0x239c   :  { %v2743_v57 = vmul.f32 -1.442695, %v2230_v56 }
0x239e   :  { %3217 = vpow2.f32 %v2743_v57 }
0x23a8   :  { %v3218_v49 = vpop.eup %3217 }
0x23a9   :  { %v2234_v47 = vadd.f32 1.0, %v3218_v49 }
0x23ab   :  { %3219 = vrcp.f32 %v2234_v47 }
0x23b5   :  { %v3220_v58 = vpop.eup %3219 }
0x23b6   :  { %v2237_v59 = vmul.f32 %v3220_v58, %v3629_v7 }
0x23b8   :  { %v2238_v61 = vadd.f32 %v2237_v59, %v3636_v16 }
0x23ba   :  { %2241 = vrot.lane.b32.xlu1 %v2238_v61, %s3390_s28  ;;  %v2239_v1 = vmul.f32 %v2238_v61, %v2121_v22 }
0x242c   :  { %v2242_v62 = vpop.permute.xlu1 %2241 }
0x242d   :  { %v2244_v63 = vmul.f32 %v2242_v62, %v2238_v61 }
0x242f   :  { %2246 = vrot.lane.b32.xlu0 %v2244_v63, %s3398_s6 }
0x24a1   :  { %v2247_v0 = vpop.permute.xlu0 %2246 }
0x24a2   :  { %v2249_v4 = vadd.f32 %v2247_v0, %v2239_v1 }
0x24a4   :  { %3221 = vtanh.f32 %v2249_v4 }
0x24ae   :  { %v3222_v5 = vpop.eup %3221 }
0x24af   :  { %2252 = vrot.lane.b32.xlu1 %v3222_v5, %s3390_s28 }
0x2521   :  { %v2253_v6 = vpop.permute.xlu1 %2252 }
0x2522   :  { %v2255_v9 = vmul.f32 %v2253_v6, %v2238_v61 }
0x2524   :  { %v2256_v10 = vpack.c.bf16 %v2255_v9, %v2255_v9 }
0x2526   :  { %v2307_v28 = vrot.slane %v2256_v10, 1  ;;  %2258 = vrot.lane.b32.xlu0 %v2256_v10, %s3398_s6 }
0x2528   :  { %2308 = vrot.lane.b32.xlu1 %v2307_v28, %s3398_s6 }
0x2598   :  { %v2259_v11 = vpop.permute.xlu0 %2258 }
0x2599   :  { %3080 = vmatmul.mubr.msk.bf16.vlgmr.msra.gmra.mrb[56].mxu0 %vm543_vm3, %v2259_v11 }
0x259a   :  { %v2309_v12 = vpop.permute.xlu1 %2308  ;;  %3092 = vmatpush3.bf16.msra.mxu0 %v3847_v42  ;;  %3095 = vmatprep.mubr.msk.bf16.mxu0 %vm3396_vm2, %v3395_v3 }
0x259b   :  { %3088 = vmatmul.mubr.msk.bf16.vlgmr.msra.gmra.mrb[56].mxu1 %vm543_vm3, %v2309_v12  ;;  %3093 = vmatprep.subr.bf16.mxu0 %v3395_v3 }
0x259c   :  { %3100 = vmatpush3.bf16.msra.mxu1 %v3857_v43  ;;  %3103 = vmatprep.mubr.msk.bf16.mxu1 %vm3396_vm2, %v3395_v3 }
0x259d   :  { %3101 = vmatprep.subr.bf16.mxu1 %v3395_v3 }
0x259e   :  { %3094 = vmatpush3.bf16.msra.mxu0 %v3863_v44 }
0x259f   :  { %3107 = vmatprep.subr.bf16.mxu0 %v3395_v3 }
0x25a0   :  { %3102 = vmatpush3.bf16.msra.mxu1 %v3870_v46 }
0x25a1   :  { %3115 = vmatprep.subr.bf16.mxu1 %v3395_v3 }
0x266c   :  { %v2297_v13 = vpop.f32.mrb[56].mxu0 }
0x266d   :  { %v2304_v14 = vrot.slane %v2297_v13, 6  ;;  %v3081_v15 = vpop.f32.mrb[57].mxu0 }
0x266e   :  { %v2300_v32 = vpop.f32.mrb[58].mxu0  ;;  %v2347_v17 = vpop.f32.mrb[56].mxu1 }
0x266f   :  { %v2306_v18 = vadd.f32 %v2304_v14, %v3606_v45  ;;  %v2354_v19 = vrot.slane %v2347_v17, 4  ;;  %v3082_v20 = vpop.f32.mrb[59].mxu0  ;;  %v3089_v35 = vpop.f32.mrb[57].mxu1 }
0x2670   :  { %v2350_v41 = vpop.f32.mrb[58].mxu1 }
0x2671   :  { %v2356_v54 = vadd.f32 %v2354_v19, %v3612_v50  ;;  %v3090_v2 = vpop.f32.mrb[59].mxu1  ;;  %v2358_v36 = vrot.slane %v2306_v18, 2 }
0x2673   :  { %v2361_v60 = vrot.slane %v2356_v54, 2 }
0x2675   :  { %v2363_v21 = vsel %vm652_vm7, %v2358_v36, %v2361_v60 }
0x2676   :  { %v2364_v22 = vmul.f32 %v2363_v21, %v3629_v7 }
0x2678   :  { %v2746_v23 = vmul.f32 -1.442695, %v2364_v22 }
0x267a   :  { %3223 = vpow2.f32 %v2746_v23 }
0x2684   :  { %v3224_v24 = vpop.eup %3223 }
0x2685   :  { %v2368_v25 = vadd.f32 1.0, %v3224_v24 }
0x2687   :  { %3225 = vrcp.f32 %v2368_v25 }
0x2691   :  { %v3226_v26 = vpop.eup %3225 }
0x2692   :  { %v2371_v27 = vmul.f32 %v3226_v26, %v3629_v7 }
0x2694   :  { %v2372_v29 = vadd.f32 %v2371_v27, %v3636_v16 }
0x2696   :  { %2375 = vrot.lane.b32.xlu0 %v2372_v29, %s3390_s28  ;;  %v2373_v33 = vmul.f32 %v2372_v29, %v2249_v4 }
0x2708   :  { %v2376_v30 = vpop.permute.xlu0 %2375 }
0x2709   :  { %v2378_v31 = vmul.f32 %v2376_v30, %v2372_v29 }
0x270b   :  { %2380 = vrot.lane.b32.xlu1 %v2378_v31, %s3398_s6 }
0x277d   :  { %v2381_v34 = vpop.permute.xlu1 %2380 }
0x277e   :  { %v2383_v8 = vadd.f32 %v2381_v34, %v2373_v33 }
0x2780   :  { %3227 = vtanh.f32 %v2383_v8 }
0x278a   :  { %v3228_v37 = vpop.eup %3227 }
0x278b   :  { %2386 = vrot.lane.b32.xlu0 %v3228_v37, %s3390_s28 }
0x27fd   :  { %v2387_v38 = vpop.permute.xlu0 %2386 }
0x27fe   :  { %v2389_v39 = vmul.f32 %v2387_v38, %v2372_v29 }
0x2800   :  { %v2390_v40 = vpack.c.bf16 %v2389_v39, %v2389_v39 }
0x2802   :  { %v2441_v48 = vrot.slane %v2390_v40, 1  ;;  %2392 = vrot.lane.b32.xlu1 %v2390_v40, %s3398_s6 }
0x2804   :  { %2442 = vrot.lane.b32.xlu0 %v2441_v48, %s3398_s6 }
0x2874   :  { %v2393_v51 = vpop.permute.xlu1 %2392 }
0x2875   :  { %3096 = vmatmul.mubr.msk.bf16.vlgmr.msra.gmra.mrb[60].mxu0 %vm543_vm3, %v2393_v51 }
0x2876   :  { %v2443_v52 = vpop.permute.xlu0 %2442  ;;  %3108 = vmatpush3.bf16.msra.mxu0 %v3847_v42  ;;  %3111 = vmatprep.mubr.msk.bf16.mxu0 %vm3396_vm2, %v3395_v3 }
0x2877   :  { %3104 = vmatmul.mubr.msk.bf16.vlgmr.msra.gmra.mrb[60].mxu1 %vm543_vm3, %v2443_v52  ;;  %3109 = vmatprep.subr.bf16.mxu0 %v3395_v3 }
0x2878   :  { %3116 = vmatpush3.bf16.msra.mxu1 %v3857_v43  ;;  %3119 = vmatprep.mubr.msk.bf16.mxu1 %vm3396_vm2, %v3395_v3 }
0x2879   :  { %3117 = vmatprep.subr.bf16.mxu1 %v3395_v3 }
0x287a   :  { %3110 = vmatpush3.bf16.msra.mxu0 %v3863_v44 }
0x287c   :  { %3118 = vmatpush3.bf16.msra.mxu1 %v3870_v46 }
0x2948   :  { %v2431_v53 = vpop.f32.mrb[60].mxu0 }
0x2949   :  { %v2438_v42 = vrot.slane %v2431_v53, 4  ;;  %v3097_v55 = vpop.f32.mrb[61].mxu0 }
0x294a   :  { %v2434_v56 = vpop.f32.mrb[62].mxu0  ;;  %v2481_v57 = vpop.f32.mrb[60].mxu1 }
0x294b   :  { %v2440_v49 = vadd.f32 %v2438_v42, %v3606_v45  ;;  %v2488_v47 = vrot.slane %v2481_v57, 6  ;;  %v3098_v58 = vpop.f32.mrb[63].mxu0  ;;  %v3105_v59 = vpop.f32.mrb[61].mxu1 }
0x294c   :  { %v2484_v43 = vpop.f32.mrb[62].mxu1 }
0x294d   :  { %v2492_v61 = vrot.slane %v2440_v49, 4  ;;  %v2490_v62 = vadd.f32 %v2488_v47, %v3612_v50  ;;  %v3106_v63 = vpop.f32.mrb[63].mxu1 }
0x294f   :  { %v2494_v3 = vsel %vm652_vm7, %v2492_v61, %v2490_v62 }
0x2950   :  { %v2495_v44 = vmul.f32 %v2494_v3, %v3629_v7 }
0x2952   :  { %v2749_v46 = vmul.f32 -1.442695, %v2495_v44 }
0x2954   :  { %3229 = vpow2.f32 %v2749_v46 }
0x295e   :  { %v3230_v1 = vpop.eup %3229 }
0x295f   :  { %v2499_v0 = vadd.f32 1.0, %v3230_v1 }
0x2961   :  { %3231 = vrcp.f32 %v2499_v0 }
0x296b   :  { %v3232_v4 = vpop.eup %3231 }
0x296c   :  { %v2502_v5 = vmul.f32 %v3232_v4, %v3629_v7 }
0x296e   :  { %v2503_v6 = vadd.f32 %v2502_v5, %v3636_v16 }
0x2970   :  { %2506 = vrot.lane.b32.xlu1 %v2503_v6, %s3390_s28  ;;  %v2504_v28 = vmul.f32 %v2503_v6, %v2383_v8 }
0x29e2   :  { %v2507_v9 = vpop.permute.xlu1 %2506 }
0x29e3   :  { %v2509_v10 = vmul.f32 %v2507_v9, %v2503_v6 }
0x29e5   :  { %2511 = vrot.lane.b32.xlu0 %v2509_v10, %s3398_s6 }
0x2a57   :  { %v2512_v11 = vpop.permute.xlu0 %2511 }
0x2a58   :  { %v2514_v12 = vadd.f32 %v2512_v11, %v2504_v28 }
0x2a5a   :  { %3233 = vtanh.f32 %v2514_v12 }
0x2a64   :  { %v3234_v13 = vpop.eup %3233 }
0x2a65   :  { %2517 = vrot.lane.b32.xlu1 %v3234_v13, %s3390_s28 }
0x2ad7   :  { %v2518_v14 = vpop.permute.xlu1 %2517 }
0x2ad8   :  { %v2520_v15 = vmul.f32 %v2518_v14, %v2503_v6 }
0x2ada   :  { %v2521_v32 = vpack.c.bf16 %v2520_v15, %v2520_v15 }
0x2adc   :  { %v2572_v17 = vrot.slane %v2521_v32, 1  ;;  %2523 = vrot.lane.b32.xlu0 %v2521_v32, %s3398_s6 }
0x2ade   :  { %2573 = vrot.lane.b32.xlu1 %v2572_v17, %s3398_s6 }
0x2b4e   :  { %v2524_v18 = vpop.permute.xlu0 %2523 }
0x2b4f   :  { %3112 = vmatmul.mubr.msk.bf16.vlgmr.msra.gmra.mrb[64].mxu0 %vm543_vm3, %v2524_v18 }
0x2b50   :  { %v2574_v19 = vpop.permute.xlu1 %2573 }
0x2b51   :  { %3120 = vmatmul.mubr.msk.bf16.vlgmr.msra.gmra.mrb[64].mxu1 %vm543_vm3, %v2574_v19 }
0x2c22   :  { %v2562_v20 = vpop.f32.mrb[64].mxu0 }
0x2c23   :  { %v2569_v35 = vrot.slane %v2562_v20, 2  ;;  %v3113_v41 = vpop.f32.mrb[65].mxu0 }
0x2c24   :  { %v2565_v54 = vpop.f32.mrb[66].mxu0  ;;  %v2612_v2 = vpop.f32.mrb[64].mxu1 }
0x2c25   :  { %v2571_v36 = vadd.f32 %v2569_v35, %v3606_v45  ;;  %v2618_v60 = vadd.f32 %v2612_v2, %v3612_v50  ;;  %v3114_v21 = vpop.f32.mrb[67].mxu0  ;;  %v3121_v22 = vpop.f32.mrb[65].mxu1 }
0x2c26   :  { %v2615_v23 = vpop.f32.mrb[66].mxu1 }
0x2c27   :  { %v2620_v24 = vrot.slane %v2571_v36, 6  ;;  %v2623_v25 = vrot.slane %v2618_v60, 6  ;;  %v3122_v26 = vpop.f32.mrb[67].mxu1 }
0x2c29   :  { %v2625_v27 = vsel %vm652_vm7, %v2620_v24, %v2623_v25 }
0x2c2a   :  { %v2626_v29 = vmul.f32 %v2625_v27, %v3629_v7 }
0x2c2c   :  { %v2752_v30 = vmul.f32 -1.442695, %v2626_v29 }
0x2c2e   :  { %3235 = vpow2.f32 %v2752_v30 }
0x2c38   :  { %v3236_v31 = vpop.eup %3235 }
0x2c39   :  { %v2630_v33 = vadd.f32 1.0, %v3236_v31 }
0x2c3b   :  { %3237 = vrcp.f32 %v2630_v33 }
0x2c45   :  { %v3238_v34 = vpop.eup %3237 }
0x2c46   :  { %v2633_v45 = vmul.f32 %v3238_v34, %v3629_v7 }
0x2c48   :  { %v2634_v50 = vadd.f32 %v2633_v45, %v3636_v16 }
0x2c4a   :  { %2637 = vrot.lane.b32.xlu0 %v2634_v50, %s3390_s28  ;;  %v2635_v38 = vmul.f32 %v2634_v50, %v2514_v12 }
0x2cbc   :  { %v2638_v8 = vpop.permute.xlu0 %2637 }
0x2cbd   :  { %v2640_v37 = vmul.f32 %v2638_v8, %v2634_v50 }
0x2cbf   :  { %2642 = vrot.lane.b32.xlu1 %v2640_v37, %s3398_s6 }
0x2d31   :  { %v2643_v39 = vpop.permute.xlu1 %2642 }
0x2d32   :  { %v2645_v40 = vadd.f32 %v2643_v39, %v2635_v38 }
0x2d34   :  { %3239 = vtanh.f32 %v2645_v40 }
0x2d3e   :  { %v3240_v48 = vpop.eup %3239 }
0x2d3f   :  { %2648 = vrot.lane.b32.xlu0 %v3240_v48, %s3390_s28 }
0x2db1   :  { %v2649_v51 = vpop.permute.xlu0 %2648 }
0x2db2   :  { %v2651_v52 = vmul.f32 %v2649_v51, %v2634_v50 }
0x2db4   :  { %2653 = vrot.lane.b32.xlu1 %v2651_v52, %s3398_s6  ;;  %v2666_v7 = vrot.slane %v2651_v52, 2 }
0x2db6   :  { %2667 = vrot.lane.b32.xlu0 %v2666_v7, %s3390_s28 }
0x2db8   :  { %2659 = vrot.lane.b32.xlu1 %v2645_v40, %s3399_s5 }
0x2e26   :  { %v2654_v16 = vpop.permute.xlu1 %2653 }
0x2e27   :  { %2657 = vst.msk [vmem:[#allocation2] sm:$0xf] %vm109_vm0, %v2654_v16 }
0x2e28   :  { %v2668_v53 = vpop.permute.xlu0 %2667 }
0x2e29   :  { %v2670_v42 = vsel %vm543_vm3, %v2654_v16, %v2668_v53 }
0x2e2a   :  { %v2660_v55 = vpop.permute.xlu1 %2659  ;;  %v2672_v56 = vsel %vm2671_vm8, %v2670_v42, 0.0 }
0x2e2b   :  { %2662 = vst.msk [vmem:[#allocation3] sm:$0xf] %vm109_vm0, %v2660_v55  ;;  %2673 = vst [vmem:[#allocation13] sm:$0x3] %v2672_v56 }
0x2e2c   :  { %3366 = shalt.err (!%p3363_p2)
}
0x2e2d   :  { %s3367_s16 = scalar_lea.hbm %s4044_s8, 32 }
0x2e2e   :  { %p3368_p3 = scmp.ne.s32.totalorder %s4044_s8, %s3367_s16  ;;  %p3371_p4 = scmp.lt.u32.totalorder %s3367_s16, %s4044_s8 }
0x2e30   :  { %p3373_p5 = pnand %p3371_p4, %p3368_p3 }
0x2e32   :  { %3376 = shalt.err (!%p3373_p5)
}
0x2e33   :  { %2683 = dma.vmem_to_hbm [thread:$0]  %s2681_s13, 32, %s4044_s8, [#allocation6]  }
0x2e34   :  { %3383 = dma.done.wait [#allocation6], 32  }
0x2e35   :  { %3384 = vsyncadd [#allocation6], 4294967264 }
0x2e36   :  { %2687 = vsyncpa [#allocation5], 1 }
0x2e37   :  { %2688 = vsyncpa [#allocation8], 1 }
0x2e38   :  { %2689 = vsyncpa [#allocation11], 1 }
0x2e39   :  { %2690 = vsyncpa [#allocation6], 1 }

</bundles_post_ra>
